<compile_context>
chip_gen: v5e
topology: v5e:2x2
jax: 0.10.0
libtpu: 0.0.40
codegen_flags: <defaults>
</compile_context>

<pallas_src>
import functools

import jax
import jax.numpy as jnp
from jax.experimental import pallas as pl
from jax.experimental.pallas import tpu as pltpu

LN_EPS = 1e-6
# Flip to True to use the approximate EUP reciprocal (slightly perturbs results).
APPROX_LN_RECIPROCAL = False


def embedding_kernel(ids_ref, word_hbm, pos_ref, gamma_ref, beta_ref, out_ref,
                     word_buf, sem):
    """One grid step processes one tile of T tokens of one batch row.

    ids_ref:   (B*S,)     int32   flattened token ids (SMEM, scalar-prefetched)
    word_hbm:  (V, E)     float32 word-embedding table (HBM, manual DMA gather)
    pos_ref:   (T, E)     float32 position-embedding rows for this tile (VMEM)
    gamma_ref: (1, E)     float32 LayerNorm gain
    beta_ref:  (1, E)     float32 LayerNorm bias
    out_ref:   (1, T, E)  float32 output tile
    word_buf:  (2, T, E)  float32 double-buffered gather scratch
    sem:       (2, T)     DMA semaphores (one per row copy per buffer slot)
    """
    T, E = pos_ref.shape
    V = word_hbm.shape[0]

    b = pl.program_id(0)
    j = pl.program_id(1)
    num_tiles_per_row = pl.num_programs(1)
    step = b * num_tiles_per_row + j          # linear tile index; ids base = step * T
    slot = j % 2

    def issue_row_gather(tile_step, buf_slot):
        base = tile_step * T
        for t in range(T):                    # T is a small static tile -> unrolled
            tok = ids_ref[base + t]
            tok = jnp.minimum(jnp.maximum(tok, 0), V - 1)   # clamp OOB ids
            pltpu.make_async_copy(
                word_hbm.at[pl.ds(tok, 1)],
                word_buf.at[buf_slot, pl.ds(t, 1)],
                sem.at[buf_slot, t],
            ).start()

    def wait_row_gather(buf_slot):
        for t in range(T):
            pltpu.make_async_copy(
                word_hbm.at[pl.ds(0, 1)],     # dummy src; dst/sem define the wait
                word_buf.at[buf_slot, pl.ds(t, 1)],
                sem.at[buf_slot, t],
            ).wait()

    # Prime this batch row's first tile.
    @pl.when(j == 0)
    def _():
        issue_row_gather(step, slot)

    # Prefetch the next tile of this batch row into the other buffer slot.
    # (The prefetch chain stays within the inner "arbitrary" grid axis, so the
    #  outer batch axis can safely be sharded across TensorCores.)
    @pl.when(j + 1 < num_tiles_per_row)
    def _():
        issue_row_gather(step + 1, 1 - slot)

    wait_row_gather(slot)

    # Word + position embeddings.
    emb = word_buf[slot] + pos_ref[...]                              # (T, E)

    # TencentPretrain LayerNorm: gamma * (x - mean) / (std + eps) + beta,
    # with unbiased std (divide by E - 1) and eps added to std (not variance).
    mean = jnp.mean(emb, axis=-1, keepdims=True)
    diff = emb - mean
    var = jnp.sum(diff * diff, axis=-1, keepdims=True) / (E - 1)
    std = jnp.sqrt(var)
    inv = pl.reciprocal(std + LN_EPS, approx=APPROX_LN_RECIPROCAL)   # (T, 1)
    normed = gamma_ref[...] * diff * inv + beta_ref[...]             # (T, E)

    # Dropout: identity in eval mode.
    # TODO(synk): training-mode dropout RNG masking not implemented.
    out_ref[0, :, :] = normed.astype(out_ref.dtype)


@functools.partial(jax.jit, static_argnames=("tile_tokens",))
def embedding_forward(src, seg, word_table, pos_table, gamma, beta,
                      tile_tokens=None):
    # `seg` is accepted for interface parity with Embedding.forward(src, seg);
    # the word+pos embedding stack does not consume it.
    del seg
    B, S = src.shape
    V, E = word_table.shape

    if tile_tokens is None:
        tile_tokens = next((c for c in (256, 128, 64, 32, 16, 8) if S % c == 0), S)
    T = tile_tokens
    assert S % T == 0, "sequence length must be divisible by the token tile"
    num_tiles_per_row = S // T

    ids_flat = src.reshape(B * S).astype(jnp.int32)
    pos_rows = pos_table[:S, :].astype(jnp.float32)
    gamma2 = gamma.reshape(1, E).astype(jnp.float32)
    beta2 = beta.reshape(1, E).astype(jnp.float32)

    out = pl.pallas_call(
        embedding_kernel,
        out_shape=jax.ShapeDtypeStruct((B, S, E), jnp.float32),
        grid_spec=pltpu.PrefetchScalarGridSpec(
            num_scalar_prefetch=1,
            grid=(B, num_tiles_per_row),
            in_specs=[
                pl.BlockSpec(memory_space=pl.ANY),                 # word table stays in HBM
                pl.BlockSpec((T, E), lambda b, j, ids: (j, 0)),    # position rows for tile
                pl.BlockSpec((1, E), lambda b, j, ids: (0, 0)),    # gamma
                pl.BlockSpec((1, E), lambda b, j, ids: (0, 0)),    # beta
            ],
            out_specs=pl.BlockSpec((1, T, E), lambda b, j, ids: (b, j, 0)),
            scratch_shapes=[
                pltpu.VMEM((2, T, E), jnp.float32),                # double-buffered gather
                pltpu.SemaphoreType.DMA((2, T)),
            ],
        ),
        compiler_params=pltpu.CompilerParams(
            dimension_semantics=("parallel", "arbitrary")),
    )(ids_flat, word_table.astype(jnp.float32), pos_rows, gamma2, beta2)
    return out


def reference_forward(src, word_table, pos_table, gamma, beta):
    B, S = src.shape
    emb = word_table[src] + pos_table[:S][None, :, :]
    mean = jnp.mean(emb, axis=-1, keepdims=True)
    diff = emb - mean
    var = jnp.sum(diff * diff, axis=-1, keepdims=True) / (emb.shape[-1] - 1)
    std = jnp.sqrt(var)
    return gamma * diff / (std + LN_EPS) + beta


if __name__ == "__main__":
    B, S, V, E = 2, 16, 64, 128   # batch, seq, vocab, emb_size (E lane-dense)
    key = jax.random.PRNGKey(0)
    k_src, k_seg, k_word, k_pos, k_gamma = jax.random.split(key, 5)

    src = jax.random.randint(k_src, (B, S), 0, V, dtype=jnp.int32)
    seg = jax.random.randint(k_seg, (B, S), 0, 2, dtype=jnp.int32)

    # Deterministic parameter init (normal(0, 0.02) tables, LN gamma≈1, beta=0).
    word_table = 0.02 * jax.random.normal(k_word, (V, E), dtype=jnp.float32)
    pos_table = 0.02 * jax.random.normal(k_pos, (2 * S, E), dtype=jnp.float32)
    gamma = 1.0 + 0.01 * jax.random.normal(k_gamma, (E,), dtype=jnp.float32)
    beta = jnp.zeros((E,), dtype=jnp.float32)

    # tile_tokens=8 gives two token tiles per batch row so the cross-tile
    # prefetch / double-buffer path is exercised even at this toy size.
    out = embedding_forward(src, seg, word_table, pos_table, gamma, beta,
                            tile_tokens=8)
    out = jax.block_until_ready(out)

    ref = reference_forward(src, word_table, pos_table, gamma, beta)
    assert out.shape == (B, S, E)
    assert jnp.max(jnp.abs(out - ref)) < 1e-4, float(jnp.max(jnp.abs(out - ref)))

    print("KERNEL_OK")
</pallas_src>

<mosaic_0001>
module attributes {stable_mosaic.version = 11 : i64} {
  func.func @embedding_kernel(%arg0: i32, %arg1: i32, %arg2: memref<32xi32, #tpu.memory_space<smem>>, %arg3: memref<64x128xf32, #tpu.memory_space<any>>, %arg4: memref<8x128xf32, #tpu.memory_space<vmem>>, %arg5: memref<1x128xf32, #tpu.memory_space<vmem>>, %arg6: memref<1x128xf32, #tpu.memory_space<vmem>>, %arg7: memref<1x8x128xf32, #tpu.memory_space<vmem>>, %arg8: memref<2x8x128xf32, #tpu.memory_space<vmem>>, %arg9: memref<2x8x!tpu.dma_semaphore, #tpu.memory_space<semaphore_mem>>) attributes {dimension_semantics = [#tpu.dimension_semantics<parallel>, #tpu.dimension_semantics<arbitrary>], iteration_bounds = array<i64: 2, 2>, scalar_prefetch = 1 : i64, scratch_operands = 2 : i64, tpu.core_type = #tpu.core_type<tc>, window_params = [{}, {transform_indices = @transform_1, window_bounds = array<i64: 8, 128>}, {pipeline_mode = #tpu.pipeline_mode<synchronous>, transform_indices = @transform_2, window_bounds = array<i64: 1, 128>}, {pipeline_mode = #tpu.pipeline_mode<synchronous>, transform_indices = @transform_3, window_bounds = array<i64: 1, 128>}, {transform_indices = @transform_4, window_bounds = array<i64: 1, 8, 128>}]} {
    %c2_i32 = arith.constant 2 : i32
    %0 = arith.muli %arg0, %c2_i32 : i32
    %1 = arith.addi %0, %arg1 : i32
    %c2_i32_0 = arith.constant 2 : i32
    %c0_i32 = arith.constant 0 : i32
    %2 = arith.cmpi eq, %c2_i32_0, %c0_i32 : i32
    %c1_i32 = arith.constant 1 : i32
    %3 = arith.select %2, %c1_i32, %c2_i32_0 : i32
    %4 = arith.remsi %arg1, %3 : i32
    %c0_i32_1 = arith.constant 0 : i32
    %5 = arith.cmpi ne, %4, %c0_i32_1 : i32
    %c0_i32_2 = arith.constant 0 : i32
    %6 = arith.cmpi slt, %4, %c0_i32_2 : i32
    %c0_i32_3 = arith.constant 0 : i32
    %7 = arith.cmpi slt, %3, %c0_i32_3 : i32
    %8 = arith.xori %6, %7 : i1
    %9 = arith.andi %8, %5 : i1
    %10 = arith.addi %4, %3 : i32
    %11 = arith.select %9, %10, %4 : i32
    %c0_i32_4 = arith.constant 0 : i32
    %12 = arith.cmpi eq, %arg1, %c0_i32_4 : i32
    %13 = arith.extui %12 : i1 to i32
    %c0_i32_5 = arith.constant 0 : i32
    %14 = arith.cmpi ne, %13, %c0_i32_5 : i32
    scf.if %14 {
      %c8_i32 = arith.constant 8 : i32
      %90 = arith.muli %1, %c8_i32 : i32
      %c0_i32_58 = arith.constant 0 : i32
      %91 = arith.addi %90, %c0_i32_58 : i32
      %92 = arith.index_cast %91 : i32 to index
      %93 = memref.load %arg2[%92] : memref<32xi32, #tpu.memory_space<smem>>
      %c0_i32_59 = arith.constant 0 : i32
      %94 = arith.maxsi %93, %c0_i32_59 : i32
      %c63_i32 = arith.constant 63 : i32
      %95 = arith.minsi %94, %c63_i32 : i32
      %c0_i32_60 = arith.constant 0 : i32
      %c0_i32_61 = arith.constant 0 : i32
      %96 = tpu.memref_slice %arg3[%95, %c0_i32_61] : memref<64x128xf32, #tpu.memory_space<any>> -> memref<1x128xf32, #tpu.memory_space<any>>
      %c0_i32_62 = arith.constant 0 : i32
      %c0_i32_63 = arith.constant 0 : i32
      %97 = tpu.memref_slice %arg8[%11, %c0_i32_62, %c0_i32_63] : memref<2x8x128xf32, #tpu.memory_space<vmem>> -> memref<1x1x128xf32, #tpu.memory_space<vmem>>
      %98 = tpu.memref_squeeze %97 : memref<1x1x128xf32, #tpu.memory_space<vmem>> -> memref<1x128xf32, #tpu.memory_space<vmem>>
      %99 = tpu.memref_slice %arg9[%11, %c0_i32_60] : memref<2x8x!tpu.dma_semaphore, #tpu.memory_space<semaphore_mem>> -> memref<1x1x!tpu.dma_semaphore, #tpu.memory_space<semaphore_mem>>
      %100 = tpu.memref_squeeze %99 : memref<1x1x!tpu.dma_semaphore, #tpu.memory_space<semaphore_mem>> -> memref<!tpu.dma_semaphore, #tpu.memory_space<semaphore_mem>>
      tpu.enqueue_dma source(%96 : memref<1x128xf32, #tpu.memory_space<any>>) target(%98 : memref<1x128xf32, #tpu.memory_space<vmem>>) target_semaphore(%100 : memref<!tpu.dma_semaphore, #tpu.memory_space<semaphore_mem>>)
      %c1_i32_64 = arith.constant 1 : i32
      %101 = arith.addi %90, %c1_i32_64 : i32
      %102 = arith.index_cast %101 : i32 to index
      %103 = memref.load %arg2[%102] : memref<32xi32, #tpu.memory_space<smem>>
      %c0_i32_65 = arith.constant 0 : i32
      %104 = arith.maxsi %103, %c0_i32_65 : i32
      %c63_i32_66 = arith.constant 63 : i32
      %105 = arith.minsi %104, %c63_i32_66 : i32
      %c1_i32_67 = arith.constant 1 : i32
      %c0_i32_68 = arith.constant 0 : i32
      %106 = tpu.memref_slice %arg3[%105, %c0_i32_68] : memref<64x128xf32, #tpu.memory_space<any>> -> memref<1x128xf32, #tpu.memory_space<any>>
      %c1_i32_69 = arith.constant 1 : i32
      %c0_i32_70 = arith.constant 0 : i32
      %107 = tpu.memref_slice %arg8[%11, %c1_i32_69, %c0_i32_70] : memref<2x8x128xf32, #tpu.memory_space<vmem>> -> memref<1x1x128xf32, #tpu.memory_space<vmem>>
      %108 = tpu.memref_squeeze %107 : memref<1x1x128xf32, #tpu.memory_space<vmem>> -> memref<1x128xf32, #tpu.memory_space<vmem>>
      %109 = tpu.memref_slice %arg9[%11, %c1_i32_67] : memref<2x8x!tpu.dma_semaphore, #tpu.memory_space<semaphore_mem>> -> memref<1x1x!tpu.dma_semaphore, #tpu.memory_space<semaphore_mem>>
      %110 = tpu.memref_squeeze %109 : memref<1x1x!tpu.dma_semaphore, #tpu.memory_space<semaphore_mem>> -> memref<!tpu.dma_semaphore, #tpu.memory_space<semaphore_mem>>
      tpu.enqueue_dma source(%106 : memref<1x128xf32, #tpu.memory_space<any>>) target(%108 : memref<1x128xf32, #tpu.memory_space<vmem>>) target_semaphore(%110 : memref<!tpu.dma_semaphore, #tpu.memory_space<semaphore_mem>>)
      %c2_i32_71 = arith.constant 2 : i32
      %111 = arith.addi %90, %c2_i32_71 : i32
      %112 = arith.index_cast %111 : i32 to index
      %113 = memref.load %arg2[%112] : memref<32xi32, #tpu.memory_space<smem>>
      %c0_i32_72 = arith.constant 0 : i32
      %114 = arith.maxsi %113, %c0_i32_72 : i32
      %c63_i32_73 = arith.constant 63 : i32
      %115 = arith.minsi %114, %c63_i32_73 : i32
      %c2_i32_74 = arith.constant 2 : i32
      %c0_i32_75 = arith.constant 0 : i32
      %116 = tpu.memref_slice %arg3[%115, %c0_i32_75] : memref<64x128xf32, #tpu.memory_space<any>> -> memref<1x128xf32, #tpu.memory_space<any>>
      %c2_i32_76 = arith.constant 2 : i32
      %c0_i32_77 = arith.constant 0 : i32
      %117 = tpu.memref_slice %arg8[%11, %c2_i32_76, %c0_i32_77] : memref<2x8x128xf32, #tpu.memory_space<vmem>> -> memref<1x1x128xf32, #tpu.memory_space<vmem>>
      %118 = tpu.memref_squeeze %117 : memref<1x1x128xf32, #tpu.memory_space<vmem>> -> memref<1x128xf32, #tpu.memory_space<vmem>>
      %119 = tpu.memref_slice %arg9[%11, %c2_i32_74] : memref<2x8x!tpu.dma_semaphore, #tpu.memory_space<semaphore_mem>> -> memref<1x1x!tpu.dma_semaphore, #tpu.memory_space<semaphore_mem>>
      %120 = tpu.memref_squeeze %119 : memref<1x1x!tpu.dma_semaphore, #tpu.memory_space<semaphore_mem>> -> memref<!tpu.dma_semaphore, #tpu.memory_space<semaphore_mem>>
      tpu.enqueue_dma source(%116 : memref<1x128xf32, #tpu.memory_space<any>>) target(%118 : memref<1x128xf32, #tpu.memory_space<vmem>>) target_semaphore(%120 : memref<!tpu.dma_semaphore, #tpu.memory_space<semaphore_mem>>)
      %c3_i32_78 = arith.constant 3 : i32
      %121 = arith.addi %90, %c3_i32_78 : i32
      %122 = arith.index_cast %121 : i32 to index
      %123 = memref.load %arg2[%122] : memref<32xi32, #tpu.memory_space<smem>>
      %c0_i32_79 = arith.constant 0 : i32
      %124 = arith.maxsi %123, %c0_i32_79 : i32
      %c63_i32_80 = arith.constant 63 : i32
      %125 = arith.minsi %124, %c63_i32_80 : i32
      %c3_i32_81 = arith.constant 3 : i32
      %c0_i32_82 = arith.constant 0 : i32
      %126 = tpu.memref_slice %arg3[%125, %c0_i32_82] : memref<64x128xf32, #tpu.memory_space<any>> -> memref<1x128xf32, #tpu.memory_space<any>>
      %c3_i32_83 = arith.constant 3 : i32
      %c0_i32_84 = arith.constant 0 : i32
      %127 = tpu.memref_slice %arg8[%11, %c3_i32_83, %c0_i32_84] : memref<2x8x128xf32, #tpu.memory_space<vmem>> -> memref<1x1x128xf32, #tpu.memory_space<vmem>>
      %128 = tpu.memref_squeeze %127 : memref<1x1x128xf32, #tpu.memory_space<vmem>> -> memref<1x128xf32, #tpu.memory_space<vmem>>
      %129 = tpu.memref_slice %arg9[%11, %c3_i32_81] : memref<2x8x!tpu.dma_semaphore, #tpu.memory_space<semaphore_mem>> -> memref<1x1x!tpu.dma_semaphore, #tpu.memory_space<semaphore_mem>>
      %130 = tpu.memref_squeeze %129 : memref<1x1x!tpu.dma_semaphore, #tpu.memory_space<semaphore_mem>> -> memref<!tpu.dma_semaphore, #tpu.memory_space<semaphore_mem>>
      tpu.enqueue_dma source(%126 : memref<1x128xf32, #tpu.memory_space<any>>) target(%128 : memref<1x128xf32, #tpu.memory_space<vmem>>) target_semaphore(%130 : memref<!tpu.dma_semaphore, #tpu.memory_space<semaphore_mem>>)
      %c4_i32_85 = arith.constant 4 : i32
      %131 = arith.addi %90, %c4_i32_85 : i32
      %132 = arith.index_cast %131 : i32 to index
      %133 = memref.load %arg2[%132] : memref<32xi32, #tpu.memory_space<smem>>
      %c0_i32_86 = arith.constant 0 : i32
      %134 = arith.maxsi %133, %c0_i32_86 : i32
      %c63_i32_87 = arith.constant 63 : i32
      %135 = arith.minsi %134, %c63_i32_87 : i32
      %c4_i32_88 = arith.constant 4 : i32
      %c0_i32_89 = arith.constant 0 : i32
      %136 = tpu.memref_slice %arg3[%135, %c0_i32_89] : memref<64x128xf32, #tpu.memory_space<any>> -> memref<1x128xf32, #tpu.memory_space<any>>
      %c4_i32_90 = arith.constant 4 : i32
      %c0_i32_91 = arith.constant 0 : i32
      %137 = tpu.memref_slice %arg8[%11, %c4_i32_90, %c0_i32_91] : memref<2x8x128xf32, #tpu.memory_space<vmem>> -> memref<1x1x128xf32, #tpu.memory_space<vmem>>
      %138 = tpu.memref_squeeze %137 : memref<1x1x128xf32, #tpu.memory_space<vmem>> -> memref<1x128xf32, #tpu.memory_space<vmem>>
      %139 = tpu.memref_slice %arg9[%11, %c4_i32_88] : memref<2x8x!tpu.dma_semaphore, #tpu.memory_space<semaphore_mem>> -> memref<1x1x!tpu.dma_semaphore, #tpu.memory_space<semaphore_mem>>
      %140 = tpu.memref_squeeze %139 : memref<1x1x!tpu.dma_semaphore, #tpu.memory_space<semaphore_mem>> -> memref<!tpu.dma_semaphore, #tpu.memory_space<semaphore_mem>>
      tpu.enqueue_dma source(%136 : memref<1x128xf32, #tpu.memory_space<any>>) target(%138 : memref<1x128xf32, #tpu.memory_space<vmem>>) target_semaphore(%140 : memref<!tpu.dma_semaphore, #tpu.memory_space<semaphore_mem>>)
      %c5_i32_92 = arith.constant 5 : i32
      %141 = arith.addi %90, %c5_i32_92 : i32
      %142 = arith.index_cast %141 : i32 to index
      %143 = memref.load %arg2[%142] : memref<32xi32, #tpu.memory_space<smem>>
      %c0_i32_93 = arith.constant 0 : i32
      %144 = arith.maxsi %143, %c0_i32_93 : i32
      %c63_i32_94 = arith.constant 63 : i32
      %145 = arith.minsi %144, %c63_i32_94 : i32
      %c5_i32_95 = arith.constant 5 : i32
      %c0_i32_96 = arith.constant 0 : i32
      %146 = tpu.memref_slice %arg3[%145, %c0_i32_96] : memref<64x128xf32, #tpu.memory_space<any>> -> memref<1x128xf32, #tpu.memory_space<any>>
      %c5_i32_97 = arith.constant 5 : i32
      %c0_i32_98 = arith.constant 0 : i32
      %147 = tpu.memref_slice %arg8[%11, %c5_i32_97, %c0_i32_98] : memref<2x8x128xf32, #tpu.memory_space<vmem>> -> memref<1x1x128xf32, #tpu.memory_space<vmem>>
      %148 = tpu.memref_squeeze %147 : memref<1x1x128xf32, #tpu.memory_space<vmem>> -> memref<1x128xf32, #tpu.memory_space<vmem>>
      %149 = tpu.memref_slice %arg9[%11, %c5_i32_95] : memref<2x8x!tpu.dma_semaphore, #tpu.memory_space<semaphore_mem>> -> memref<1x1x!tpu.dma_semaphore, #tpu.memory_space<semaphore_mem>>
      %150 = tpu.memref_squeeze %149 : memref<1x1x!tpu.dma_semaphore, #tpu.memory_space<semaphore_mem>> -> memref<!tpu.dma_semaphore, #tpu.memory_space<semaphore_mem>>
      tpu.enqueue_dma source(%146 : memref<1x128xf32, #tpu.memory_space<any>>) target(%148 : memref<1x128xf32, #tpu.memory_space<vmem>>) target_semaphore(%150 : memref<!tpu.dma_semaphore, #tpu.memory_space<semaphore_mem>>)
      %c6_i32_99 = arith.constant 6 : i32
      %151 = arith.addi %90, %c6_i32_99 : i32
      %152 = arith.index_cast %151 : i32 to index
      %153 = memref.load %arg2[%152] : memref<32xi32, #tpu.memory_space<smem>>
      %c0_i32_100 = arith.constant 0 : i32
      %154 = arith.maxsi %153, %c0_i32_100 : i32
      %c63_i32_101 = arith.constant 63 : i32
      %155 = arith.minsi %154, %c63_i32_101 : i32
      %c6_i32_102 = arith.constant 6 : i32
      %c0_i32_103 = arith.constant 0 : i32
      %156 = tpu.memref_slice %arg3[%155, %c0_i32_103] : memref<64x128xf32, #tpu.memory_space<any>> -> memref<1x128xf32, #tpu.memory_space<any>>
      %c6_i32_104 = arith.constant 6 : i32
      %c0_i32_105 = arith.constant 0 : i32
      %157 = tpu.memref_slice %arg8[%11, %c6_i32_104, %c0_i32_105] : memref<2x8x128xf32, #tpu.memory_space<vmem>> -> memref<1x1x128xf32, #tpu.memory_space<vmem>>
      %158 = tpu.memref_squeeze %157 : memref<1x1x128xf32, #tpu.memory_space<vmem>> -> memref<1x128xf32, #tpu.memory_space<vmem>>
      %159 = tpu.memref_slice %arg9[%11, %c6_i32_102] : memref<2x8x!tpu.dma_semaphore, #tpu.memory_space<semaphore_mem>> -> memref<1x1x!tpu.dma_semaphore, #tpu.memory_space<semaphore_mem>>
      %160 = tpu.memref_squeeze %159 : memref<1x1x!tpu.dma_semaphore, #tpu.memory_space<semaphore_mem>> -> memref<!tpu.dma_semaphore, #tpu.memory_space<semaphore_mem>>
      tpu.enqueue_dma source(%156 : memref<1x128xf32, #tpu.memory_space<any>>) target(%158 : memref<1x128xf32, #tpu.memory_space<vmem>>) target_semaphore(%160 : memref<!tpu.dma_semaphore, #tpu.memory_space<semaphore_mem>>)
      %c7_i32_106 = arith.constant 7 : i32
      %161 = arith.addi %90, %c7_i32_106 : i32
      %162 = arith.index_cast %161 : i32 to index
      %163 = memref.load %arg2[%162] : memref<32xi32, #tpu.memory_space<smem>>
      %c0_i32_107 = arith.constant 0 : i32
      %164 = arith.maxsi %163, %c0_i32_107 : i32
      %c63_i32_108 = arith.constant 63 : i32
      %165 = arith.minsi %164, %c63_i32_108 : i32
      %c7_i32_109 = arith.constant 7 : i32
      %c0_i32_110 = arith.constant 0 : i32
      %166 = tpu.memref_slice %arg3[%165, %c0_i32_110] : memref<64x128xf32, #tpu.memory_space<any>> -> memref<1x128xf32, #tpu.memory_space<any>>
      %c7_i32_111 = arith.constant 7 : i32
      %c0_i32_112 = arith.constant 0 : i32
      %167 = tpu.memref_slice %arg8[%11, %c7_i32_111, %c0_i32_112] : memref<2x8x128xf32, #tpu.memory_space<vmem>> -> memref<1x1x128xf32, #tpu.memory_space<vmem>>
      %168 = tpu.memref_squeeze %167 : memref<1x1x128xf32, #tpu.memory_space<vmem>> -> memref<1x128xf32, #tpu.memory_space<vmem>>
      %169 = tpu.memref_slice %arg9[%11, %c7_i32_109] : memref<2x8x!tpu.dma_semaphore, #tpu.memory_space<semaphore_mem>> -> memref<1x1x!tpu.dma_semaphore, #tpu.memory_space<semaphore_mem>>
      %170 = tpu.memref_squeeze %169 : memref<1x1x!tpu.dma_semaphore, #tpu.memory_space<semaphore_mem>> -> memref<!tpu.dma_semaphore, #tpu.memory_space<semaphore_mem>>
      tpu.enqueue_dma source(%166 : memref<1x128xf32, #tpu.memory_space<any>>) target(%168 : memref<1x128xf32, #tpu.memory_space<vmem>>) target_semaphore(%170 : memref<!tpu.dma_semaphore, #tpu.memory_space<semaphore_mem>>)
    } else {
    }
    %c1_i32_6 = arith.constant 1 : i32
    %15 = arith.addi %arg1, %c1_i32_6 : i32
    %c2_i32_7 = arith.constant 2 : i32
    %16 = arith.cmpi slt, %15, %c2_i32_7 : i32
    %17 = arith.extui %16 : i1 to i32
    %c0_i32_8 = arith.constant 0 : i32
    %18 = arith.cmpi ne, %17, %c0_i32_8 : i32
    scf.if %18 {
      %c1_i32_58 = arith.constant 1 : i32
      %90 = arith.addi %1, %c1_i32_58 : i32
      %c1_i32_59 = arith.constant 1 : i32
      %91 = arith.subi %c1_i32_59, %11 : i32
      %c8_i32 = arith.constant 8 : i32
      %92 = arith.muli %90, %c8_i32 : i32
      %c0_i32_60 = arith.constant 0 : i32
      %93 = arith.addi %92, %c0_i32_60 : i32
      %94 = arith.index_cast %93 : i32 to index
      %95 = memref.load %arg2[%94] : memref<32xi32, #tpu.memory_space<smem>>
      %c0_i32_61 = arith.constant 0 : i32
      %96 = arith.maxsi %95, %c0_i32_61 : i32
      %c63_i32 = arith.constant 63 : i32
      %97 = arith.minsi %96, %c63_i32 : i32
      %c0_i32_62 = arith.constant 0 : i32
      %c0_i32_63 = arith.constant 0 : i32
      %98 = tpu.memref_slice %arg3[%97, %c0_i32_63] : memref<64x128xf32, #tpu.memory_space<any>> -> memref<1x128xf32, #tpu.memory_space<any>>
      %c0_i32_64 = arith.constant 0 : i32
      %c0_i32_65 = arith.constant 0 : i32
      %99 = tpu.memref_slice %arg8[%91, %c0_i32_64, %c0_i32_65] : memref<2x8x128xf32, #tpu.memory_space<vmem>> -> memref<1x1x128xf32, #tpu.memory_space<vmem>>
      %100 = tpu.memref_squeeze %99 : memref<1x1x128xf32, #tpu.memory_space<vmem>> -> memref<1x128xf32, #tpu.memory_space<vmem>>
      %101 = tpu.memref_slice %arg9[%91, %c0_i32_62] : memref<2x8x!tpu.dma_semaphore, #tpu.memory_space<semaphore_mem>> -> memref<1x1x!tpu.dma_semaphore, #tpu.memory_space<semaphore_mem>>
      %102 = tpu.memref_squeeze %101 : memref<1x1x!tpu.dma_semaphore, #tpu.memory_space<semaphore_mem>> -> memref<!tpu.dma_semaphore, #tpu.memory_space<semaphore_mem>>
      tpu.enqueue_dma source(%98 : memref<1x128xf32, #tpu.memory_space<any>>) target(%100 : memref<1x128xf32, #tpu.memory_space<vmem>>) target_semaphore(%102 : memref<!tpu.dma_semaphore, #tpu.memory_space<semaphore_mem>>)
      %c1_i32_66 = arith.constant 1 : i32
      %103 = arith.addi %92, %c1_i32_66 : i32
      %104 = arith.index_cast %103 : i32 to index
      %105 = memref.load %arg2[%104] : memref<32xi32, #tpu.memory_space<smem>>
      %c0_i32_67 = arith.constant 0 : i32
      %106 = arith.maxsi %105, %c0_i32_67 : i32
      %c63_i32_68 = arith.constant 63 : i32
      %107 = arith.minsi %106, %c63_i32_68 : i32
      %c1_i32_69 = arith.constant 1 : i32
      %c0_i32_70 = arith.constant 0 : i32
      %108 = tpu.memref_slice %arg3[%107, %c0_i32_70] : memref<64x128xf32, #tpu.memory_space<any>> -> memref<1x128xf32, #tpu.memory_space<any>>
      %c1_i32_71 = arith.constant 1 : i32
      %c0_i32_72 = arith.constant 0 : i32
      %109 = tpu.memref_slice %arg8[%91, %c1_i32_71, %c0_i32_72] : memref<2x8x128xf32, #tpu.memory_space<vmem>> -> memref<1x1x128xf32, #tpu.memory_space<vmem>>
      %110 = tpu.memref_squeeze %109 : memref<1x1x128xf32, #tpu.memory_space<vmem>> -> memref<1x128xf32, #tpu.memory_space<vmem>>
      %111 = tpu.memref_slice %arg9[%91, %c1_i32_69] : memref<2x8x!tpu.dma_semaphore, #tpu.memory_space<semaphore_mem>> -> memref<1x1x!tpu.dma_semaphore, #tpu.memory_space<semaphore_mem>>
      %112 = tpu.memref_squeeze %111 : memref<1x1x!tpu.dma_semaphore, #tpu.memory_space<semaphore_mem>> -> memref<!tpu.dma_semaphore, #tpu.memory_space<semaphore_mem>>
      tpu.enqueue_dma source(%108 : memref<1x128xf32, #tpu.memory_space<any>>) target(%110 : memref<1x128xf32, #tpu.memory_space<vmem>>) target_semaphore(%112 : memref<!tpu.dma_semaphore, #tpu.memory_space<semaphore_mem>>)
      %c2_i32_73 = arith.constant 2 : i32
      %113 = arith.addi %92, %c2_i32_73 : i32
      %114 = arith.index_cast %113 : i32 to index
      %115 = memref.load %arg2[%114] : memref<32xi32, #tpu.memory_space<smem>>
      %c0_i32_74 = arith.constant 0 : i32
      %116 = arith.maxsi %115, %c0_i32_74 : i32
      %c63_i32_75 = arith.constant 63 : i32
      %117 = arith.minsi %116, %c63_i32_75 : i32
      %c2_i32_76 = arith.constant 2 : i32
      %c0_i32_77 = arith.constant 0 : i32
      %118 = tpu.memref_slice %arg3[%117, %c0_i32_77] : memref<64x128xf32, #tpu.memory_space<any>> -> memref<1x128xf32, #tpu.memory_space<any>>
      %c2_i32_78 = arith.constant 2 : i32
      %c0_i32_79 = arith.constant 0 : i32
      %119 = tpu.memref_slice %arg8[%91, %c2_i32_78, %c0_i32_79] : memref<2x8x128xf32, #tpu.memory_space<vmem>> -> memref<1x1x128xf32, #tpu.memory_space<vmem>>
      %120 = tpu.memref_squeeze %119 : memref<1x1x128xf32, #tpu.memory_space<vmem>> -> memref<1x128xf32, #tpu.memory_space<vmem>>
      %121 = tpu.memref_slice %arg9[%91, %c2_i32_76] : memref<2x8x!tpu.dma_semaphore, #tpu.memory_space<semaphore_mem>> -> memref<1x1x!tpu.dma_semaphore, #tpu.memory_space<semaphore_mem>>
      %122 = tpu.memref_squeeze %121 : memref<1x1x!tpu.dma_semaphore, #tpu.memory_space<semaphore_mem>> -> memref<!tpu.dma_semaphore, #tpu.memory_space<semaphore_mem>>
      tpu.enqueue_dma source(%118 : memref<1x128xf32, #tpu.memory_space<any>>) target(%120 : memref<1x128xf32, #tpu.memory_space<vmem>>) target_semaphore(%122 : memref<!tpu.dma_semaphore, #tpu.memory_space<semaphore_mem>>)
      %c3_i32_80 = arith.constant 3 : i32
      %123 = arith.addi %92, %c3_i32_80 : i32
      %124 = arith.index_cast %123 : i32 to index
      %125 = memref.load %arg2[%124] : memref<32xi32, #tpu.memory_space<smem>>
      %c0_i32_81 = arith.constant 0 : i32
      %126 = arith.maxsi %125, %c0_i32_81 : i32
      %c63_i32_82 = arith.constant 63 : i32
      %127 = arith.minsi %126, %c63_i32_82 : i32
      %c3_i32_83 = arith.constant 3 : i32
      %c0_i32_84 = arith.constant 0 : i32
      %128 = tpu.memref_slice %arg3[%127, %c0_i32_84] : memref<64x128xf32, #tpu.memory_space<any>> -> memref<1x128xf32, #tpu.memory_space<any>>
      %c3_i32_85 = arith.constant 3 : i32
      %c0_i32_86 = arith.constant 0 : i32
      %129 = tpu.memref_slice %arg8[%91, %c3_i32_85, %c0_i32_86] : memref<2x8x128xf32, #tpu.memory_space<vmem>> -> memref<1x1x128xf32, #tpu.memory_space<vmem>>
      %130 = tpu.memref_squeeze %129 : memref<1x1x128xf32, #tpu.memory_space<vmem>> -> memref<1x128xf32, #tpu.memory_space<vmem>>
      %131 = tpu.memref_slice %arg9[%91, %c3_i32_83] : memref<2x8x!tpu.dma_semaphore, #tpu.memory_space<semaphore_mem>> -> memref<1x1x!tpu.dma_semaphore, #tpu.memory_space<semaphore_mem>>
      %132 = tpu.memref_squeeze %131 : memref<1x1x!tpu.dma_semaphore, #tpu.memory_space<semaphore_mem>> -> memref<!tpu.dma_semaphore, #tpu.memory_space<semaphore_mem>>
      tpu.enqueue_dma source(%128 : memref<1x128xf32, #tpu.memory_space<any>>) target(%130 : memref<1x128xf32, #tpu.memory_space<vmem>>) target_semaphore(%132 : memref<!tpu.dma_semaphore, #tpu.memory_space<semaphore_mem>>)
      %c4_i32_87 = arith.constant 4 : i32
      %133 = arith.addi %92, %c4_i32_87 : i32
      %134 = arith.index_cast %133 : i32 to index
      %135 = memref.load %arg2[%134] : memref<32xi32, #tpu.memory_space<smem>>
      %c0_i32_88 = arith.constant 0 : i32
      %136 = arith.maxsi %135, %c0_i32_88 : i32
      %c63_i32_89 = arith.constant 63 : i32
      %137 = arith.minsi %136, %c63_i32_89 : i32
      %c4_i32_90 = arith.constant 4 : i32
      %c0_i32_91 = arith.constant 0 : i32
      %138 = tpu.memref_slice %arg3[%137, %c0_i32_91] : memref<64x128xf32, #tpu.memory_space<any>> -> memref<1x128xf32, #tpu.memory_space<any>>
      %c4_i32_92 = arith.constant 4 : i32
      %c0_i32_93 = arith.constant 0 : i32
      %139 = tpu.memref_slice %arg8[%91, %c4_i32_92, %c0_i32_93] : memref<2x8x128xf32, #tpu.memory_space<vmem>> -> memref<1x1x128xf32, #tpu.memory_space<vmem>>
      %140 = tpu.memref_squeeze %139 : memref<1x1x128xf32, #tpu.memory_space<vmem>> -> memref<1x128xf32, #tpu.memory_space<vmem>>
      %141 = tpu.memref_slice %arg9[%91, %c4_i32_90] : memref<2x8x!tpu.dma_semaphore, #tpu.memory_space<semaphore_mem>> -> memref<1x1x!tpu.dma_semaphore, #tpu.memory_space<semaphore_mem>>
      %142 = tpu.memref_squeeze %141 : memref<1x1x!tpu.dma_semaphore, #tpu.memory_space<semaphore_mem>> -> memref<!tpu.dma_semaphore, #tpu.memory_space<semaphore_mem>>
      tpu.enqueue_dma source(%138 : memref<1x128xf32, #tpu.memory_space<any>>) target(%140 : memref<1x128xf32, #tpu.memory_space<vmem>>) target_semaphore(%142 : memref<!tpu.dma_semaphore, #tpu.memory_space<semaphore_mem>>)
      %c5_i32_94 = arith.constant 5 : i32
      %143 = arith.addi %92, %c5_i32_94 : i32
      %144 = arith.index_cast %143 : i32 to index
      %145 = memref.load %arg2[%144] : memref<32xi32, #tpu.memory_space<smem>>
      %c0_i32_95 = arith.constant 0 : i32
      %146 = arith.maxsi %145, %c0_i32_95 : i32
      %c63_i32_96 = arith.constant 63 : i32
      %147 = arith.minsi %146, %c63_i32_96 : i32
      %c5_i32_97 = arith.constant 5 : i32
      %c0_i32_98 = arith.constant 0 : i32
      %148 = tpu.memref_slice %arg3[%147, %c0_i32_98] : memref<64x128xf32, #tpu.memory_space<any>> -> memref<1x128xf32, #tpu.memory_space<any>>
      %c5_i32_99 = arith.constant 5 : i32
      %c0_i32_100 = arith.constant 0 : i32
      %149 = tpu.memref_slice %arg8[%91, %c5_i32_99, %c0_i32_100] : memref<2x8x128xf32, #tpu.memory_space<vmem>> -> memref<1x1x128xf32, #tpu.memory_space<vmem>>
      %150 = tpu.memref_squeeze %149 : memref<1x1x128xf32, #tpu.memory_space<vmem>> -> memref<1x128xf32, #tpu.memory_space<vmem>>
      %151 = tpu.memref_slice %arg9[%91, %c5_i32_97] : memref<2x8x!tpu.dma_semaphore, #tpu.memory_space<semaphore_mem>> -> memref<1x1x!tpu.dma_semaphore, #tpu.memory_space<semaphore_mem>>
      %152 = tpu.memref_squeeze %151 : memref<1x1x!tpu.dma_semaphore, #tpu.memory_space<semaphore_mem>> -> memref<!tpu.dma_semaphore, #tpu.memory_space<semaphore_mem>>
      tpu.enqueue_dma source(%148 : memref<1x128xf32, #tpu.memory_space<any>>) target(%150 : memref<1x128xf32, #tpu.memory_space<vmem>>) target_semaphore(%152 : memref<!tpu.dma_semaphore, #tpu.memory_space<semaphore_mem>>)
      %c6_i32_101 = arith.constant 6 : i32
      %153 = arith.addi %92, %c6_i32_101 : i32
      %154 = arith.index_cast %153 : i32 to index
      %155 = memref.load %arg2[%154] : memref<32xi32, #tpu.memory_space<smem>>
      %c0_i32_102 = arith.constant 0 : i32
      %156 = arith.maxsi %155, %c0_i32_102 : i32
      %c63_i32_103 = arith.constant 63 : i32
      %157 = arith.minsi %156, %c63_i32_103 : i32
      %c6_i32_104 = arith.constant 6 : i32
      %c0_i32_105 = arith.constant 0 : i32
      %158 = tpu.memref_slice %arg3[%157, %c0_i32_105] : memref<64x128xf32, #tpu.memory_space<any>> -> memref<1x128xf32, #tpu.memory_space<any>>
      %c6_i32_106 = arith.constant 6 : i32
      %c0_i32_107 = arith.constant 0 : i32
      %159 = tpu.memref_slice %arg8[%91, %c6_i32_106, %c0_i32_107] : memref<2x8x128xf32, #tpu.memory_space<vmem>> -> memref<1x1x128xf32, #tpu.memory_space<vmem>>
      %160 = tpu.memref_squeeze %159 : memref<1x1x128xf32, #tpu.memory_space<vmem>> -> memref<1x128xf32, #tpu.memory_space<vmem>>
      %161 = tpu.memref_slice %arg9[%91, %c6_i32_104] : memref<2x8x!tpu.dma_semaphore, #tpu.memory_space<semaphore_mem>> -> memref<1x1x!tpu.dma_semaphore, #tpu.memory_space<semaphore_mem>>
      %162 = tpu.memref_squeeze %161 : memref<1x1x!tpu.dma_semaphore, #tpu.memory_space<semaphore_mem>> -> memref<!tpu.dma_semaphore, #tpu.memory_space<semaphore_mem>>
      tpu.enqueue_dma source(%158 : memref<1x128xf32, #tpu.memory_space<any>>) target(%160 : memref<1x128xf32, #tpu.memory_space<vmem>>) target_semaphore(%162 : memref<!tpu.dma_semaphore, #tpu.memory_space<semaphore_mem>>)
      %c7_i32_108 = arith.constant 7 : i32
      %163 = arith.addi %92, %c7_i32_108 : i32
      %164 = arith.index_cast %163 : i32 to index
      %165 = memref.load %arg2[%164] : memref<32xi32, #tpu.memory_space<smem>>
      %c0_i32_109 = arith.constant 0 : i32
      %166 = arith.maxsi %165, %c0_i32_109 : i32
      %c63_i32_110 = arith.constant 63 : i32
      %167 = arith.minsi %166, %c63_i32_110 : i32
      %c7_i32_111 = arith.constant 7 : i32
      %c0_i32_112 = arith.constant 0 : i32
      %168 = tpu.memref_slice %arg3[%167, %c0_i32_112] : memref<64x128xf32, #tpu.memory_space<any>> -> memref<1x128xf32, #tpu.memory_space<any>>
      %c7_i32_113 = arith.constant 7 : i32
      %c0_i32_114 = arith.constant 0 : i32
      %169 = tpu.memref_slice %arg8[%91, %c7_i32_113, %c0_i32_114] : memref<2x8x128xf32, #tpu.memory_space<vmem>> -> memref<1x1x128xf32, #tpu.memory_space<vmem>>
      %170 = tpu.memref_squeeze %169 : memref<1x1x128xf32, #tpu.memory_space<vmem>> -> memref<1x128xf32, #tpu.memory_space<vmem>>
      %171 = tpu.memref_slice %arg9[%91, %c7_i32_111] : memref<2x8x!tpu.dma_semaphore, #tpu.memory_space<semaphore_mem>> -> memref<1x1x!tpu.dma_semaphore, #tpu.memory_space<semaphore_mem>>
      %172 = tpu.memref_squeeze %171 : memref<1x1x!tpu.dma_semaphore, #tpu.memory_space<semaphore_mem>> -> memref<!tpu.dma_semaphore, #tpu.memory_space<semaphore_mem>>
      tpu.enqueue_dma source(%168 : memref<1x128xf32, #tpu.memory_space<any>>) target(%170 : memref<1x128xf32, #tpu.memory_space<vmem>>) target_semaphore(%172 : memref<!tpu.dma_semaphore, #tpu.memory_space<semaphore_mem>>)
    } else {
    }
    %c0_i32_9 = arith.constant 0 : i32
    %c0_i32_10 = arith.constant 0 : i32
    %c0_i32_11 = arith.constant 0 : i32
    %19 = tpu.memref_slice %arg3[%c0_i32_10, %c0_i32_11] : memref<64x128xf32, #tpu.memory_space<any>> -> memref<1x128xf32, #tpu.memory_space<any>>
    %c0_i32_12 = arith.constant 0 : i32
    %c0_i32_13 = arith.constant 0 : i32
    %20 = tpu.memref_slice %arg8[%11, %c0_i32_12, %c0_i32_13] : memref<2x8x128xf32, #tpu.memory_space<vmem>> -> memref<1x1x128xf32, #tpu.memory_space<vmem>>
    %21 = tpu.memref_squeeze %20 : memref<1x1x128xf32, #tpu.memory_space<vmem>> -> memref<1x128xf32, #tpu.memory_space<vmem>>
    %22 = tpu.memref_slice %arg9[%11, %c0_i32_9] : memref<2x8x!tpu.dma_semaphore, #tpu.memory_space<semaphore_mem>> -> memref<1x1x!tpu.dma_semaphore, #tpu.memory_space<semaphore_mem>>
    %23 = tpu.memref_squeeze %22 : memref<1x1x!tpu.dma_semaphore, #tpu.memory_space<semaphore_mem>> -> memref<!tpu.dma_semaphore, #tpu.memory_space<semaphore_mem>>
    tpu.wait_dma2 semaphore(%23 : memref<!tpu.dma_semaphore, #tpu.memory_space<semaphore_mem>>) src(%19 : memref<1x128xf32, #tpu.memory_space<any>>) dst(%21 : memref<1x128xf32, #tpu.memory_space<vmem>>)
    %c1_i32_14 = arith.constant 1 : i32
    %c0_i32_15 = arith.constant 0 : i32
    %c0_i32_16 = arith.constant 0 : i32
    %24 = tpu.memref_slice %arg3[%c0_i32_15, %c0_i32_16] : memref<64x128xf32, #tpu.memory_space<any>> -> memref<1x128xf32, #tpu.memory_space<any>>
    %c1_i32_17 = arith.constant 1 : i32
    %c0_i32_18 = arith.constant 0 : i32
    %25 = tpu.memref_slice %arg8[%11, %c1_i32_17, %c0_i32_18] : memref<2x8x128xf32, #tpu.memory_space<vmem>> -> memref<1x1x128xf32, #tpu.memory_space<vmem>>
    %26 = tpu.memref_squeeze %25 : memref<1x1x128xf32, #tpu.memory_space<vmem>> -> memref<1x128xf32, #tpu.memory_space<vmem>>
    %27 = tpu.memref_slice %arg9[%11, %c1_i32_14] : memref<2x8x!tpu.dma_semaphore, #tpu.memory_space<semaphore_mem>> -> memref<1x1x!tpu.dma_semaphore, #tpu.memory_space<semaphore_mem>>
    %28 = tpu.memref_squeeze %27 : memref<1x1x!tpu.dma_semaphore, #tpu.memory_space<semaphore_mem>> -> memref<!tpu.dma_semaphore, #tpu.memory_space<semaphore_mem>>
    tpu.wait_dma2 semaphore(%28 : memref<!tpu.dma_semaphore, #tpu.memory_space<semaphore_mem>>) src(%24 : memref<1x128xf32, #tpu.memory_space<any>>) dst(%26 : memref<1x128xf32, #tpu.memory_space<vmem>>)
    %c2_i32_19 = arith.constant 2 : i32
    %c0_i32_20 = arith.constant 0 : i32
    %c0_i32_21 = arith.constant 0 : i32
    %29 = tpu.memref_slice %arg3[%c0_i32_20, %c0_i32_21] : memref<64x128xf32, #tpu.memory_space<any>> -> memref<1x128xf32, #tpu.memory_space<any>>
    %c2_i32_22 = arith.constant 2 : i32
    %c0_i32_23 = arith.constant 0 : i32
    %30 = tpu.memref_slice %arg8[%11, %c2_i32_22, %c0_i32_23] : memref<2x8x128xf32, #tpu.memory_space<vmem>> -> memref<1x1x128xf32, #tpu.memory_space<vmem>>
    %31 = tpu.memref_squeeze %30 : memref<1x1x128xf32, #tpu.memory_space<vmem>> -> memref<1x128xf32, #tpu.memory_space<vmem>>
    %32 = tpu.memref_slice %arg9[%11, %c2_i32_19] : memref<2x8x!tpu.dma_semaphore, #tpu.memory_space<semaphore_mem>> -> memref<1x1x!tpu.dma_semaphore, #tpu.memory_space<semaphore_mem>>
    %33 = tpu.memref_squeeze %32 : memref<1x1x!tpu.dma_semaphore, #tpu.memory_space<semaphore_mem>> -> memref<!tpu.dma_semaphore, #tpu.memory_space<semaphore_mem>>
    tpu.wait_dma2 semaphore(%33 : memref<!tpu.dma_semaphore, #tpu.memory_space<semaphore_mem>>) src(%29 : memref<1x128xf32, #tpu.memory_space<any>>) dst(%31 : memref<1x128xf32, #tpu.memory_space<vmem>>)
    %c3_i32 = arith.constant 3 : i32
    %c0_i32_24 = arith.constant 0 : i32
    %c0_i32_25 = arith.constant 0 : i32
    %34 = tpu.memref_slice %arg3[%c0_i32_24, %c0_i32_25] : memref<64x128xf32, #tpu.memory_space<any>> -> memref<1x128xf32, #tpu.memory_space<any>>
    %c3_i32_26 = arith.constant 3 : i32
    %c0_i32_27 = arith.constant 0 : i32
    %35 = tpu.memref_slice %arg8[%11, %c3_i32_26, %c0_i32_27] : memref<2x8x128xf32, #tpu.memory_space<vmem>> -> memref<1x1x128xf32, #tpu.memory_space<vmem>>
    %36 = tpu.memref_squeeze %35 : memref<1x1x128xf32, #tpu.memory_space<vmem>> -> memref<1x128xf32, #tpu.memory_space<vmem>>
    %37 = tpu.memref_slice %arg9[%11, %c3_i32] : memref<2x8x!tpu.dma_semaphore, #tpu.memory_space<semaphore_mem>> -> memref<1x1x!tpu.dma_semaphore, #tpu.memory_space<semaphore_mem>>
    %38 = tpu.memref_squeeze %37 : memref<1x1x!tpu.dma_semaphore, #tpu.memory_space<semaphore_mem>> -> memref<!tpu.dma_semaphore, #tpu.memory_space<semaphore_mem>>
    tpu.wait_dma2 semaphore(%38 : memref<!tpu.dma_semaphore, #tpu.memory_space<semaphore_mem>>) src(%34 : memref<1x128xf32, #tpu.memory_space<any>>) dst(%36 : memref<1x128xf32, #tpu.memory_space<vmem>>)
    %c4_i32 = arith.constant 4 : i32
    %c0_i32_28 = arith.constant 0 : i32
    %c0_i32_29 = arith.constant 0 : i32
    %39 = tpu.memref_slice %arg3[%c0_i32_28, %c0_i32_29] : memref<64x128xf32, #tpu.memory_space<any>> -> memref<1x128xf32, #tpu.memory_space<any>>
    %c4_i32_30 = arith.constant 4 : i32
    %c0_i32_31 = arith.constant 0 : i32
    %40 = tpu.memref_slice %arg8[%11, %c4_i32_30, %c0_i32_31] : memref<2x8x128xf32, #tpu.memory_space<vmem>> -> memref<1x1x128xf32, #tpu.memory_space<vmem>>
    %41 = tpu.memref_squeeze %40 : memref<1x1x128xf32, #tpu.memory_space<vmem>> -> memref<1x128xf32, #tpu.memory_space<vmem>>
    %42 = tpu.memref_slice %arg9[%11, %c4_i32] : memref<2x8x!tpu.dma_semaphore, #tpu.memory_space<semaphore_mem>> -> memref<1x1x!tpu.dma_semaphore, #tpu.memory_space<semaphore_mem>>
    %43 = tpu.memref_squeeze %42 : memref<1x1x!tpu.dma_semaphore, #tpu.memory_space<semaphore_mem>> -> memref<!tpu.dma_semaphore, #tpu.memory_space<semaphore_mem>>
    tpu.wait_dma2 semaphore(%43 : memref<!tpu.dma_semaphore, #tpu.memory_space<semaphore_mem>>) src(%39 : memref<1x128xf32, #tpu.memory_space<any>>) dst(%41 : memref<1x128xf32, #tpu.memory_space<vmem>>)
    %c5_i32 = arith.constant 5 : i32
    %c0_i32_32 = arith.constant 0 : i32
    %c0_i32_33 = arith.constant 0 : i32
    %44 = tpu.memref_slice %arg3[%c0_i32_32, %c0_i32_33] : memref<64x128xf32, #tpu.memory_space<any>> -> memref<1x128xf32, #tpu.memory_space<any>>
    %c5_i32_34 = arith.constant 5 : i32
    %c0_i32_35 = arith.constant 0 : i32
    %45 = tpu.memref_slice %arg8[%11, %c5_i32_34, %c0_i32_35] : memref<2x8x128xf32, #tpu.memory_space<vmem>> -> memref<1x1x128xf32, #tpu.memory_space<vmem>>
    %46 = tpu.memref_squeeze %45 : memref<1x1x128xf32, #tpu.memory_space<vmem>> -> memref<1x128xf32, #tpu.memory_space<vmem>>
    %47 = tpu.memref_slice %arg9[%11, %c5_i32] : memref<2x8x!tpu.dma_semaphore, #tpu.memory_space<semaphore_mem>> -> memref<1x1x!tpu.dma_semaphore, #tpu.memory_space<semaphore_mem>>
    %48 = tpu.memref_squeeze %47 : memref<1x1x!tpu.dma_semaphore, #tpu.memory_space<semaphore_mem>> -> memref<!tpu.dma_semaphore, #tpu.memory_space<semaphore_mem>>
    tpu.wait_dma2 semaphore(%48 : memref<!tpu.dma_semaphore, #tpu.memory_space<semaphore_mem>>) src(%44 : memref<1x128xf32, #tpu.memory_space<any>>) dst(%46 : memref<1x128xf32, #tpu.memory_space<vmem>>)
    %c6_i32 = arith.constant 6 : i32
    %c0_i32_36 = arith.constant 0 : i32
    %c0_i32_37 = arith.constant 0 : i32
    %49 = tpu.memref_slice %arg3[%c0_i32_36, %c0_i32_37] : memref<64x128xf32, #tpu.memory_space<any>> -> memref<1x128xf32, #tpu.memory_space<any>>
    %c6_i32_38 = arith.constant 6 : i32
    %c0_i32_39 = arith.constant 0 : i32
    %50 = tpu.memref_slice %arg8[%11, %c6_i32_38, %c0_i32_39] : memref<2x8x128xf32, #tpu.memory_space<vmem>> -> memref<1x1x128xf32, #tpu.memory_space<vmem>>
    %51 = tpu.memref_squeeze %50 : memref<1x1x128xf32, #tpu.memory_space<vmem>> -> memref<1x128xf32, #tpu.memory_space<vmem>>
    %52 = tpu.memref_slice %arg9[%11, %c6_i32] : memref<2x8x!tpu.dma_semaphore, #tpu.memory_space<semaphore_mem>> -> memref<1x1x!tpu.dma_semaphore, #tpu.memory_space<semaphore_mem>>
    %53 = tpu.memref_squeeze %52 : memref<1x1x!tpu.dma_semaphore, #tpu.memory_space<semaphore_mem>> -> memref<!tpu.dma_semaphore, #tpu.memory_space<semaphore_mem>>
    tpu.wait_dma2 semaphore(%53 : memref<!tpu.dma_semaphore, #tpu.memory_space<semaphore_mem>>) src(%49 : memref<1x128xf32, #tpu.memory_space<any>>) dst(%51 : memref<1x128xf32, #tpu.memory_space<vmem>>)
    %c7_i32 = arith.constant 7 : i32
    %c0_i32_40 = arith.constant 0 : i32
    %c0_i32_41 = arith.constant 0 : i32
    %54 = tpu.memref_slice %arg3[%c0_i32_40, %c0_i32_41] : memref<64x128xf32, #tpu.memory_space<any>> -> memref<1x128xf32, #tpu.memory_space<any>>
    %c7_i32_42 = arith.constant 7 : i32
    %c0_i32_43 = arith.constant 0 : i32
    %55 = tpu.memref_slice %arg8[%11, %c7_i32_42, %c0_i32_43] : memref<2x8x128xf32, #tpu.memory_space<vmem>> -> memref<1x1x128xf32, #tpu.memory_space<vmem>>
    %56 = tpu.memref_squeeze %55 : memref<1x1x128xf32, #tpu.memory_space<vmem>> -> memref<1x128xf32, #tpu.memory_space<vmem>>
    %57 = tpu.memref_slice %arg9[%11, %c7_i32] : memref<2x8x!tpu.dma_semaphore, #tpu.memory_space<semaphore_mem>> -> memref<1x1x!tpu.dma_semaphore, #tpu.memory_space<semaphore_mem>>
    %58 = tpu.memref_squeeze %57 : memref<1x1x!tpu.dma_semaphore, #tpu.memory_space<semaphore_mem>> -> memref<!tpu.dma_semaphore, #tpu.memory_space<semaphore_mem>>
    tpu.wait_dma2 semaphore(%58 : memref<!tpu.dma_semaphore, #tpu.memory_space<semaphore_mem>>) src(%54 : memref<1x128xf32, #tpu.memory_space<any>>) dst(%56 : memref<1x128xf32, #tpu.memory_space<vmem>>)
    %59 = arith.index_cast %11 : i32 to index
    %c0 = arith.constant 0 : index
    %c0_44 = arith.constant 0 : index
    %60 = vector.load %arg8[%59, %c0, %c0_44] : memref<2x8x128xf32, #tpu.memory_space<vmem>>, vector<1x8x128xf32>
    %61 = vector.shape_cast %60 : vector<1x8x128xf32> to vector<8x128xf32>
    %c0_45 = arith.constant 0 : index
    %c0_46 = arith.constant 0 : index
    %62 = vector.load %arg4[%c0_45, %c0_46] : memref<8x128xf32, #tpu.memory_space<vmem>>, vector<8x128xf32>
    %63 = arith.addf %61, %62 : vector<8x128xf32>
    %cst = arith.constant dense<0.000000e+00> : vector<8xf32>
    %64 = vector.multi_reduction <add>, %63, %cst [1] : vector<8x128xf32> to vector<8xf32>
    %65 = vector.shape_cast %64 : vector<8xf32> to vector<8x1xf32>
    %cst_47 = arith.constant 1.280000e+02 : f32
    %66 = vector.broadcast %cst_47 : f32 to vector<8x1xf32>
    %67 = arith.divf %65, %66 : vector<8x1xf32>
    %68 = vector.broadcast %67 : vector<8x1xf32> to vector<8x128xf32>
    %69 = arith.subf %63, %68 : vector<8x128xf32>
    %70 = arith.mulf %69, %69 : vector<8x128xf32>
    %cst_48 = arith.constant dense<0.000000e+00> : vector<8xf32>
    %71 = vector.multi_reduction <add>, %70, %cst_48 [1] : vector<8x128xf32> to vector<8xf32>
    %72 = vector.shape_cast %71 : vector<8xf32> to vector<8x1xf32>
    %cst_49 = arith.constant 1.270000e+02 : f32
    %73 = vector.broadcast %cst_49 : f32 to vector<8x1xf32>
    %74 = arith.divf %72, %73 : vector<8x1xf32>
    %75 = math.sqrt %74 : vector<8x1xf32>
    %cst_50 = arith.constant 9.99999997E-7 : f32
    %76 = vector.broadcast %cst_50 : f32 to vector<8x1xf32>
    %77 = arith.addf %75, %76 : vector<8x1xf32>
    %78 = tpu.reciprocal %77 : vector<8x1xf32> -> vector<8x1xf32>
    %c0_51 = arith.constant 0 : index
    %c0_52 = arith.constant 0 : index
    %79 = vector.load %arg5[%c0_51, %c0_52] : memref<1x128xf32, #tpu.memory_space<vmem>>, vector<1x128xf32>
    %80 = vector.broadcast %79 : vector<1x128xf32> to vector<8x128xf32>
    %81 = arith.mulf %80, %69 : vector<8x128xf32>
    %82 = vector.broadcast %78 : vector<8x1xf32> to vector<8x128xf32>
    %83 = arith.mulf %81, %82 : vector<8x128xf32>
    %c0_53 = arith.constant 0 : index
    %c0_54 = arith.constant 0 : index
    %84 = vector.load %arg6[%c0_53, %c0_54] : memref<1x128xf32, #tpu.memory_space<vmem>>, vector<1x128xf32>
    %85 = vector.broadcast %84 : vector<1x128xf32> to vector<8x128xf32>
    %86 = arith.addf %83, %85 : vector<8x128xf32>
    %c0_55 = arith.constant 0 : index
    %c0_56 = arith.constant 0 : index
    %c0_57 = arith.constant 0 : index
    %87 = vector.load %arg7[%c0_55, %c0_56, %c0_57] : memref<1x8x128xf32, #tpu.memory_space<vmem>>, vector<1x8x128xf32>
    %88 = vector.shape_cast %87 : vector<1x8x128xf32> to vector<8x128xf32>
    %89 = vector.shape_cast %86 : vector<8x128xf32> to vector<1x8x128xf32>
    tpu.vector_store %arg7[%c0_55, %c0_56, %c0_57], %89 {strides = array<i32>} : memref<1x8x128xf32, #tpu.memory_space<vmem>>, vector<1x8x128xf32>,
    return
  }
  func.func @transform_1(%arg0: i32, %arg1: i32, %arg2: memref<32xi32, #tpu.memory_space<smem>>) -> (i32, i32) {
    %c0_i32 = arith.constant 0 : i32
    %c0_i32_0 = arith.constant 0 : i32
    return %arg1, %c0_i32 : i32, i32
  }
  func.func @transform_2(%arg0: i32, %arg1: i32, %arg2: memref<32xi32, #tpu.memory_space<smem>>) -> (i32, i32) {
    %c0_i32 = arith.constant 0 : i32
    %c0_i32_0 = arith.constant 0 : i32
    %c0_i32_1 = arith.constant 0 : i32
    return %c0_i32, %c0_i32_0 : i32, i32
  }
  func.func @transform_3(%arg0: i32, %arg1: i32, %arg2: memref<32xi32, #tpu.memory_space<smem>>) -> (i32, i32) {
    %c0_i32 = arith.constant 0 : i32
    %c0_i32_0 = arith.constant 0 : i32
    %c0_i32_1 = arith.constant 0 : i32
    return %c0_i32, %c0_i32_0 : i32, i32
  }
  func.func @transform_4(%arg0: i32, %arg1: i32, %arg2: memref<32xi32, #tpu.memory_space<smem>>) -> (i32, i32, i32) {
    %c0_i32 = arith.constant 0 : i32
    %c0_i32_0 = arith.constant 0 : i32
    return %arg0, %arg1, %c0_i32 : i32, i32, i32
  }
}

</mosaic_0001>

<bundles_post_ra>
// kernel: embedding_forward.1
= control target key start
LH: loop header
LB: loop body
LE: loop exit
PB: predicated region body
PF: predicated region fallthrough
CT: control target
= control target key end

     0   :  { %s1913_s21 = smov [#allocation5]   ;;  %s2712_s0 = inlined_call_operand.vmem [shape: s32[32], index: 0, kind: input, shape index: {}]   ;;  %s2713_s1 = inlined_call_operand.hbm [shape: f32[64,128], index: 1, kind: input, shape index: {}]   ;;  %s2714_s2 = inlined_call_operand.vmem [shape: f32[16,128], index: 2, kind: input, shape index: {}]   ;;  %s2715_s3 = inlined_call_operand.vmem [shape: f32[1,128], index: 3, kind: input, shape index: {}]   ;;  %s2716_s4 = inlined_call_operand.vmem [shape: f32[1,128], index: 4, kind: input, shape index: {}]   ;;  %s2717_s5 = inlined_call_operand.hbm [shape: f32[2,16,128], index: 5, kind: output, shape index: {}]  }
   0x1   :  { %2751 = sst [smem:[#allocation85_spill]] %s2714_s2  ;;  %s11_s20 = sshll.u32 %s2712_s0, 4  ;;  %s12_s20 = int_to_ptr.vmem [resolvable:$true] %s11_s20 }
   0x2   :  { %2752 = sst [smem:[#allocation86_spill]] %s2715_s3 }
   0x3   :  { %2753 = sst [smem:[#allocation87_spill]] %s2716_s4 }
   0x4   :  { %2754 = sst [smem:[#allocation88_spill]] %s2717_s5 }
   0x5   :  { %14 = dma.vmem_to_smem %s12_s20, 16, %s1913_s21, [#allocation4] }
   0x6   :  { %1859 = dma.done.wait [#allocation4], 16 }
   0x7   :  { %1860 = vsyncadd [#allocation4], 4294967280 }
   0x8   :  { %17 = sfence }
   0x9   :  { %18 = vsyncpa [#allocation7], 0 }
   0xa   :  { %20 = vsyncpa [#allocation7 + $0x1], 0  ;;  %s1950_s22 = smov 0   ;;  %s1952_s23 = smov 0  }
   0xb   :  { %s1954_s24 = smov 0   ;;  %s1956_s25 = smov 0  }
   0xc   :  { %s1958_s26 = smov 0   ;;  %s1960_s27 = smov 0  }
   0xd   :  { %s1962_s0 = smov 0   ;;  %s1964_s28 = smov 0  }
   0xe LB: > { %2755 = sst [smem:[#allocation68_spill]] %s1883_s22  ;;  %s1015_s29 = sadd.s32 4294967295, %s1911_s28   ;;  %s1911_s28 = sphi %s1964_s28, %s26_s28   ;;  %s1907_s0 = sphi %s1962_s0, %s2827_s0   ;;  %s1903_s27 = sphi %s1960_s27, %s2826_s27   ;;  %s1899_s26 = sphi %s1958_s26, %s2825_s26   ;;  %s1895_s25 = sphi %s1956_s25, %s2824_s25   ;;  %s1891_s24 = sphi %s1954_s24, %s2823_s24   ;;  %s1887_s23 = sphi %s1952_s23, %s2822_s23   ;;  %s1883_s22 = sphi %s1950_s22, %s2821_s22  }
   0xf   : > { %2756 = sst [smem:[#allocation69_spill]] %s1887_s23  ;;  %s1016_s30 = sadd.s32 4294967294, %s1911_s28  }
  0x10   : > { %2757 = sst [smem:[#allocation70_spill]] %s1891_s24  ;;  %s35_s6 = sadd.s32 1, %s1903_s27 }
  0x11   : > { %2758 = sst [smem:[#allocation71_spill]] %s1903_s27  ;;  %p36_p0 = scmp.ge.s32.totalorder %s35_s6, 2 }
  0x12   : > { %2759 = sst [smem:[#allocation72_spill]] %s1907_s0  ;;  %s38_s7 = sadd.s32 1, %s1907_s0 }
  0x13   : > { %2760 = sst [smem:[#allocation73_spill]] %s1911_s28  ;;  %p125_p1 = scmp.ne.s32.totalorder %s1891_s24, %s1887_s23 }
  0x14   : > { %p126_p2 = scmp.eq.s32.totalorder %s1015_s29, 3  ;;  %s2829_s6 = smov (%p36_p0, %s35_s6), 0 }
  0x15   : > { %2761 = sst [smem:[#allocation74_spill]] %s2829_s6  ;;  %s2831_s7 = smov (!%p36_p0, %s38_s7), %s1907_s0 }
  0x16   : > { %s111_s8 = ssub.s32 %s1903_s27, %s2829_s6  ;;  %p2001_p3 = por %p126_p2, %p125_p1 }
  0x17   : > { %p40_p4 = scmp.ge.s32.totalorder %s2831_s7, 2  ;;  %p131_p5 = scmp.ne.s32.totalorder %s1887_s23, %s1883_s22 }
  0x18   : > { %s2762_s9 = scalar_select %p2001_p3, 1, 0 }
  0x19   : > { %p132_p6 = scmp.eq.s32.totalorder %s1016_s30, 3  ;;  %p1019_p7 = scmp.ge.s32.totalorder %s1911_s28, 1 }
  0x1a   : > { %2763 = sst [smem:[#allocation75_spill]] %s2762_s9  ;;  %s2833_s7 = smov (%p40_p4, %s2831_s7), 0 }
  0x1b   : > { %2764 = sst [smem:[#allocation76_spill]] %s2833_s7  ;;  %p2010_p8 = por %p132_p6, %p131_p5 }
  0x1c   : > { %p163_p9 = scmp.lt.s32.totalorder %s1911_s28, 5  ;;  %s110_s11 = ssub.s32 %s1907_s0, %s2833_s7 }
  0x1d   : > { %s2765_s10 = scalar_select %p2010_p8, 1, 0 }
  0x1e   : > { %s115_s12 = sadd.s32 1, %s1891_s24  ;;  %s112_s13 = sor.u32 %s111_s8, %s110_s11 }
  0x1f   : > { %2766 = sst [smem:[#allocation77_spill]] %s2765_s10  ;;  %p164_p10 = pnand %p1019_p7, %p163_p9 }
  0x20   : > { %p113_p11 = scmp.eq.s32.totalorder %s112_s13, 0 }
  0x21   : > { %167 = sbr.rel (%p164_p10) target bundleno = 909 (0x38d), region = 32 }
  0x22   : > { %s2019_s14 = scalar_select %p113_p11, %s1891_s24, %s115_s12  }
  0x24   : > { %2767 = sst [smem:[#allocation78_spill]] %s2019_s14 }
  0x26   : > { %s2718_s15 = sand.u32 1, %s1887_s23   ;;  %p186_p12 = scmp.lt.s32.totalorder %s1895_s25, 1 }
  0x27   : > { %s2025_s16 = sshll.u32 %s2718_s15, 3  ;;  %s1022_s17 = sshll.u32 %s1899_s26, 1 }
  0x28   : > { %s191_s18 = sadd.s32 %s1895_s25, %s1022_s17  ;;  %p192_p13 = scmp.lt.s32.totalorder %s1895_s25, 0 }
  0x29   : > { %s187_s19 = scalar_select %p186_p12, %s1895_s25, 1 }
  0x2a   : > { %s193_s20 = ssub.s32 0, %s1895_s25  ;;  %s2768_s2 = sld [smem:[#allocation85_spill]] }
  0x2b   : > { %s1021_s21 = sshll.u32 %s187_s19, 3  ;;  %s1023_s29 = smin.u32 %s1895_s25, %s193_s20 }
  0x2c   : > { %s195_s12 = sand.u32 1, %s1023_s29   ;;  %p1259_p0 = scmp.eq.s32.totalorder %s1895_s25, 0 }
  0x2d   : > { %s196_s13 = ssub.s32 0, %s195_s12  ;;  %s2039_s15 = sshll.u32 %s191_s18, 3 }
  0x2e   : > { %s2835_s13 = smov (!%p192_p13, %s196_s13), %s195_s12  ;;  %2770 = sst [smem:[#allocation80_spill]] %s2039_s15 }
  0x2f   : > { %p1025_p1 = scmp.lt.s32.totalorder %s2835_s13, 0  ;;  %s202_s26 = sadd.s32 2, %s2835_s13 }
  0x30   : > { %s2036_s11 = scalar_lea.vmem %s2768_s2, %s1021_s21  ;;  %s231_s21 = sadd.s32 1, %s2039_s15 }
  0x31   : > { %2769 = sst [smem:[#allocation79_spill]] %s2036_s11  ;;  %s2837_s26 = smov (!%p1025_p1, %s202_s26), %s2835_s13 }
  0x32   : > { %s1204_s17 = scalar_select %p1259_p0, [#allocation5], [#allocation42] }
  0x33   : > { %s1205_s19 = scalar_select %p1259_p0, %s2039_s15, 0 }
  0x34   : > { %s1033_s20 = sshll.u32 %s2837_s26, 3  ;;  %s2839_s21 = smov (!%p1259_p0, %s231_s21), 0 }
  0x35   : > { %s209_s29 = sld [smem:[%s1204_s17 + %s1205_s19]]  ;;  %s2050_s30 = scalar_lea.vmem [#allocation2], %s1033_s20 }
  0x36   : > { %2771 = sst [smem:[#allocation81_spill]] %s2050_s30  ;;  %s227_s18 = sshll.u32 %s2050_s30, 4  ;;  %s2053_s18 = int_to_ptr.vmem [resolvable:$true] %s227_s18 }
  0x37   : > { %s848_s8 = scalar_lea.vmem %s2050_s30, 1 [#allocation2]  ;;  %s2060_s13 = scalar_lea.sflag [#allocation3], %s1033_s20 }
  0x38   : > { %s1207_s12 = scalar_select %p1259_p0, [#allocation5], [#allocation43] }
  0x39   : > { %s2063_s2 = scalar_lea.sflag %s2060_s13, 1 [#allocation3]  ;;  %s2065_s17 = sshll.u32 %s848_s8, 4 }
  0x3a   : > { %2772 = sst [smem:[#allocation82_spill]] %s2065_s17  ;;  %s2080_s14 = scalar_lea.sflag %s2060_s13, 2 [#allocation3] }
  0x3b   : > { %p210_p2 = scmp.gt.s32.totalorder %s209_s29, 0  ;;  %p1028_p4 = scmp.lt.s32.totalorder %s209_s29, 63 }
  0x3c   : > { %s2067_s19 = sld [smem:[%s1207_s12 + %s2839_s21]]  ;;  %s2092_s27 = scalar_lea.hbm %s2713_s1, 64 }
  0x3d   : > { %s2841_s29 = smov (!%p210_p2, %s209_s29), 0 }
  0x3e   : > { %s2843_s29 = smov (!%p1028_p4, %s2841_s29), 63 }
  0x3f   : > { %s2074_s20 = scalar_select %p1259_p0, [#allocation5], [#allocation44] }
  0x40   : > { %s214_s8 = scalar_lea.hbm %s2713_s1, %s2843_s29 }
  0x41   : > { %s2082_s24 = sshll.u32 %s214_s8, 4  ;;  %s226_s24 = int_to_ptr.hbm [resolvable:$true] %s2082_s24 }
  0x42   : > { %s1351_s21 = sshra.s32 %s226_s24, 4  ;;  %s1352_s21 = int_to_ptr.hbm [resolvable:$true] %s1351_s21 }
  0x43   : > { %s1353_s12 = scalar_lea.hbm %s1352_s21, 1  ;;  %p1358_p11 = scmp.lt.s32.totalorder %s1352_s21, %s2713_s1 }
  0x44   : > { %p1354_p7 = scmp.ne.s32.totalorder %s1352_s21, %s1353_s12  ;;  %p1359_p12 = scmp.lt.s32.totalorder %s2092_s27, %s1353_s12 }
  0x46   : > { %p1355_p9 = pnand %p1354_p7, %p1259_p0  ;;  %p1360_p13 = por %p1359_p12, %p1358_p11 }
  0x48   : > { %p1356_p10 = pneg %p1355_p9 }
  0x4a   : > { %p1361_p1 = pnand %p1360_p13, %p1356_p10 }
  0x4c   : > { %1364 = shalt.err (!%p1361_p1)  }
  0x4d   : > { %s1365_s8 = sshra.s32 %s2053_s18, 4  ;;  %s1914_s6 = smov [#allocation2]   ;;  %s1366_s8 = int_to_ptr.vmem [resolvable:$true] %s1365_s8 }
  0x4e   : > { %s1367_s7 = scalar_lea.vmem %s1366_s8, 1  ;;  %s2101_s17 = scalar_lea.vmem %s1914_s6, 16 }
  0x4f   : > { %p1368_p2 = scmp.ne.s32.totalorder %s1366_s8, %s1367_s7  ;;  %p1372_p9 = scmp.lt.s32.totalorder %s1366_s8, [#allocation2] }
  0x50   : > { %p1373_p6 = scmp.lt.s32.totalorder %s2101_s17, %s1367_s7 }
  0x51   : > { %p1369_p4 = pnand %p1368_p2, %p1259_p0 }
  0x52   : > { %p1374_p5 = por %p1373_p6, %p1372_p9 }
  0x53   : > { %p1370_p7 = pneg %p1369_p4 }
  0x55   : > { %p1375_p8 = pnand %p1374_p5, %p1370_p7 }
  0x57   : > { %1378 = shalt.err (!%p1375_p8)  }
  0x58   : > { %1206 = dma.hbm_to_vmem [thread:$0]  (%p1259_p0), %s226_s24, 16, %s2053_s18, %s2060_s13 }
  0x59   : > { %p2773_p10 = scmp.gt.s32.totalorder %s2067_s19, 0  ;;  %s2774_s21 = sadd.s32 2, %s2039_s15 }
  0x5a   : > { %s2845_s21 = smov (!%p1259_p0, %s2774_s21), 0  ;;  %p2775_p8 = scmp.lt.s32.totalorder %s2067_s19, 63 }
  0x5b   : > { %s234_s7 = scalar_select %p2773_p10, %s2067_s19, 0 }
  0x5c   : > { %s2118_s12 = sld [smem:[%s2074_s20 + %s2845_s21]]  ;;  %s2776_s0 = scalar_lea.vmem %s2050_s30, 2 [#allocation2] }
  0x5d   : > { %s2847_s7 = smov (!%p2775_p8, %s234_s7), 63  ;;  %s2122_s29 = sshll.u32 %s2776_s0, 4 }
  0x5e   : > { %2777 = sst [smem:[#allocation83_spill]] %s2122_s29  ;;  %s237_s10 = scalar_lea.hbm %s2713_s1, %s2847_s7 }
  0x5f   : > { %s248_s24 = sshll.u32 %s237_s10, 4  ;;  %s277_s18 = sadd.s32 3, %s2039_s15  ;;  %s249_s24 = int_to_ptr.hbm [resolvable:$true] %s248_s24 }
  0x60   : > { %s862_s22 = scalar_lea.vmem %s2050_s30, 3 [#allocation2]  ;;  %s1379_s28 = sshra.s32 %s249_s24, 4  ;;  %s1380_s28 = int_to_ptr.hbm [resolvable:$true] %s1379_s28 }
  0x61   : > { %s1381_s19 = scalar_lea.hbm %s1380_s28, 1  ;;  %p1386_p12 = scmp.lt.s32.totalorder %s1380_s28, %s2713_s1 }
  0x62   : > { %p1382_p5 = scmp.ne.s32.totalorder %s1380_s28, %s1381_s19  ;;  %p1387_p13 = scmp.lt.s32.totalorder %s2092_s27, %s1381_s19 }
  0x64   : > { %p1383_p6 = pnand %p1382_p5, %p1259_p0  ;;  %p1388_p1 = por %p1387_p13, %p1386_p12 }
  0x66   : > { %p1384_p11 = pneg %p1383_p6 }
  0x68   : > { %p1389_p2 = pnand %p1388_p1, %p1384_p11 }
  0x6a   : > { %1392 = shalt.err (!%p1389_p2)  }
  0x6b   : > { %s2778_s7 = sld [smem:[#allocation82_spill]] }
  0x71   : > { %s2779_s10 = int_to_ptr.vmem [resolvable:$true] %s2778_s7 }
  0x72   : > { %s1393_s0 = sshra.s32 %s2779_s10, 4  ;;  %s1394_s0 = int_to_ptr.vmem [resolvable:$true] %s1393_s0 }
  0x73   : > { %s1395_s8 = scalar_lea.vmem %s1394_s0, 1  ;;  %p1400_p10 = scmp.lt.s32.totalorder %s1394_s0, [#allocation2] }
  0x74   : > { %p1396_p4 = scmp.ne.s32.totalorder %s1394_s0, %s1395_s8  ;;  %p1401_p8 = scmp.lt.s32.totalorder %s2101_s17, %s1395_s8 }
  0x76   : > { %p1397_p7 = pnand %p1396_p4, %p1259_p0  ;;  %p1402_p5 = por %p1401_p8, %p1400_p10 }
  0x78   : > { %p1398_p9 = pneg %p1397_p7 }
  0x7a   : > { %p1403_p6 = pnand %p1402_p5, %p1398_p9 }
  0x7c   : > { %1406 = shalt.err (!%p1403_p6)  }
  0x7d   : > { %s2780_s28 = smov %s2779_s10  ;;  %p256_p11 = scmp.gt.s32.totalorder %s2118_s12, 0 }
  0x7e   : > { %1209 = dma.hbm_to_vmem [thread:$0]  (%p1259_p0), %s249_s24, 16, %s2780_s28, %s2063_s2 }
  0x7f   : > { %s1213_s6 = scalar_select %p1259_p0, [#allocation5], [#allocation45] }
  0x80   : > { %p1041_p12 = scmp.lt.s32.totalorder %s2118_s12, 63  ;;  %s2849_s18 = smov (!%p1259_p0, %s277_s18), 0 }
  0x81   : > { %s2851_s12 = smov (!%p256_p11, %s2118_s12), 0  ;;  %s2153_s19 = sld [smem:[%s1213_s6 + %s2849_s18]] }
  0x82   : > { %s2156_s20 = scalar_lea.sflag %s2060_s13, 3 [#allocation3]  ;;  %s2853_s12 = smov (!%p1041_p12, %s2851_s12), 63 }
  0x83   : > { %s2160_s21 = sshll.u32 %s862_s22, 4  ;;  %s300_s24 = sadd.s32 4, %s2039_s15 }
  0x84   : > { %2781 = sst [smem:[#allocation82_spill]] %s2160_s21  ;;  %s260_s0 = scalar_lea.hbm %s2713_s1, %s2853_s12 }
  0x85   : > { %s271_s8 = sshll.u32 %s260_s0, 4  ;;  %s869_s28 = scalar_lea.vmem %s2050_s30, 4 [#allocation2]  ;;  %s272_s8 = int_to_ptr.hbm [resolvable:$true] %s271_s8 }
  0x86   : > { %s2169_s29 = scalar_lea.sflag %s2060_s13, 4 [#allocation3]  ;;  %s1407_s18 = sshra.s32 %s272_s8, 4  ;;  %s1408_s18 = int_to_ptr.hbm [resolvable:$true] %s1407_s18 }
  0x87   : > { %s1409_s6 = scalar_lea.hbm %s1408_s18, 1  ;;  %p1414_p4 = scmp.lt.s32.totalorder %s1408_s18, %s2713_s1 }
  0x88   : > { %p1410_p13 = scmp.ne.s32.totalorder %s1408_s18, %s1409_s6  ;;  %p1415_p7 = scmp.lt.s32.totalorder %s2092_s27, %s1409_s6 }
  0x8a   : > { %p1411_p1 = pnand %p1410_p13, %p1259_p0  ;;  %p1416_p9 = por %p1415_p7, %p1414_p4 }
  0x8c   : > { %p1412_p2 = pneg %p1411_p1 }
  0x8e   : > { %p1417_p10 = pnand %p1416_p9, %p1412_p2 }
  0x90   : > { %1420 = shalt.err (!%p1417_p10)  }
  0x91   : > { %s2782_s12 = sld [smem:[#allocation83_spill]] }
  0x97   : > { %s2783_s7 = int_to_ptr.vmem [resolvable:$true] %s2782_s12 }
  0x98   : > { %s1421_s10 = sshra.s32 %s2783_s7, 4  ;;  %s1422_s10 = int_to_ptr.vmem [resolvable:$true] %s1421_s10 }
  0x99   : > { %s1423_s0 = scalar_lea.vmem %s1422_s10, 1  ;;  %p1428_p11 = scmp.lt.s32.totalorder %s1422_s10, [#allocation2] }
  0x9a   : > { %p1424_p8 = scmp.ne.s32.totalorder %s1422_s10, %s1423_s0  ;;  %p1429_p12 = scmp.lt.s32.totalorder %s2101_s17, %s1423_s0 }
  0x9c   : > { %p1425_p5 = pnand %p1424_p8, %p1259_p0  ;;  %p1430_p13 = por %p1429_p12, %p1428_p11 }
  0x9e   : > { %p1426_p6 = pneg %p1425_p5 }
  0xa0   : > { %p1431_p1 = pnand %p1430_p13, %p1426_p6 }
  0xa2   : > { %1434 = shalt.err (!%p1431_p1)  }
  0xa3   : > { %s2784_s4 = smov %s2783_s7  ;;  %p279_p2 = scmp.gt.s32.totalorder %s2153_s19, 0 }
  0xa4   : > { %1212 = dma.hbm_to_vmem [thread:$0]  (%p1259_p0), %s272_s8, 16, %s2784_s4, %s2080_s14 }
  0xa5   : > { %p1048_p4 = scmp.lt.s32.totalorder %s2153_s19, 63  ;;  %s2855_s19 = smov (!%p279_p2, %s2153_s19), 0 }
  0xa6   : > { %s1216_s18 = scalar_select %p1259_p0, [#allocation5], [#allocation46] }
  0xa7   : > { %s2857_s24 = smov (!%p1259_p0, %s300_s24), 0  ;;  %s2859_s19 = smov (!%p1048_p4, %s2855_s19), 63 }
  0xa8   : > { %s2196_s6 = sld [smem:[%s1216_s18 + %s2857_s24]]  ;;  %s2200_s22 = sshll.u32 %s869_s28, 4 }
  0xa9   : > { %2785 = sst [smem:[#allocation83_spill]] %s2200_s22  ;;  %s283_s8 = scalar_lea.hbm %s2713_s1, %s2859_s19 }
  0xaa   : > { %s294_s10 = sshll.u32 %s283_s8, 4  ;;  %s323_s0 = sadd.s32 5, %s2039_s15  ;;  %s295_s10 = int_to_ptr.hbm [resolvable:$true] %s294_s10 }
  0xab   : > { %s876_s4 = scalar_lea.vmem %s2050_s30, 5 [#allocation2]  ;;  %s1435_s21 = sshra.s32 %s295_s10, 4  ;;  %s1436_s21 = int_to_ptr.hbm [resolvable:$true] %s1435_s21 }
  0xac   : > { %s1437_s9 = scalar_lea.hbm %s1436_s21, 1  ;;  %p1442_p8 = scmp.lt.s32.totalorder %s1436_s21, %s2713_s1 }
  0xad   : > { %p1438_p7 = scmp.ne.s32.totalorder %s1436_s21, %s1437_s9  ;;  %p1443_p5 = scmp.lt.s32.totalorder %s2092_s27, %s1437_s9 }
  0xaf   : > { %p1439_p9 = pnand %p1438_p7, %p1259_p0  ;;  %p1444_p6 = por %p1443_p5, %p1442_p8 }
  0xb1   : > { %p1440_p10 = pneg %p1439_p9 }
  0xb3   : > { %p1445_p11 = pnand %p1444_p6, %p1440_p10 }
  0xb5   : > { %1448 = shalt.err (!%p1445_p11)  }
  0xb6   : > { %s2786_s19 = sld [smem:[#allocation82_spill]] }
  0xbc   : > { %s2787_s18 = int_to_ptr.vmem [resolvable:$true] %s2786_s19 }
  0xbd   : > { %s1449_s12 = sshra.s32 %s2787_s18, 4  ;;  %s1450_s12 = int_to_ptr.vmem [resolvable:$true] %s1449_s12 }
  0xbe   : > { %s1451_s7 = scalar_lea.vmem %s1450_s12, 1  ;;  %p1456_p2 = scmp.lt.s32.totalorder %s1450_s12, [#allocation2] }
  0xbf   : > { %p1452_p12 = scmp.ne.s32.totalorder %s1450_s12, %s1451_s7  ;;  %p1457_p4 = scmp.lt.s32.totalorder %s2101_s17, %s1451_s7 }
  0xc1   : > { %p1453_p13 = pnand %p1452_p12, %p1259_p0  ;;  %p1458_p7 = por %p1457_p4, %p1456_p2 }
  0xc3   : > { %p1454_p1 = pneg %p1453_p13 }
  0xc5   : > { %p1459_p9 = pnand %p1458_p7, %p1454_p1 }
  0xc7   : > { %1462 = shalt.err (!%p1459_p9)  }
  0xc8   : > { %s2788_s9 = smov %s2787_s18  ;;  %p302_p10 = scmp.gt.s32.totalorder %s2196_s6, 0 }
  0xc9   : > { %1215 = dma.hbm_to_vmem [thread:$0]  (%p1259_p0), %s295_s10, 16, %s2788_s9, %s2156_s20 }
  0xca   : > { %s1219_s21 = scalar_select %p1259_p0, [#allocation5], [#allocation47] }
  0xcb   : > { %p1055_p8 = scmp.lt.s32.totalorder %s2196_s6, 63  ;;  %s2861_s0 = smov (!%p1259_p0, %s323_s0), 0 }
  0xcc   : > { %s2863_s6 = smov (!%p302_p10, %s2196_s6), 0  ;;  %s2231_s8 = sld [smem:[%s1219_s21 + %s2861_s0]] }
  0xcd   : > { %s2234_s24 = scalar_lea.sflag %s2060_s13, 5 [#allocation3]  ;;  %s2865_s6 = smov (!%p1055_p8, %s2863_s6), 63 }
  0xce   : > { %s2238_s28 = sshll.u32 %s876_s4, 4  ;;  %s346_s10 = sadd.s32 6, %s2039_s15 }
  0xcf   : > { %2789 = sst [smem:[#allocation82_spill]] %s2238_s28  ;;  %s306_s12 = scalar_lea.hbm %s2713_s1, %s2865_s6 }
  0xd0   : > { %s317_s7 = sshll.u32 %s306_s12, 4  ;;  %s883_s9 = scalar_lea.vmem %s2050_s30, 6 [#allocation2]  ;;  %s318_s7 = int_to_ptr.hbm [resolvable:$true] %s317_s7 }
  0xd1   : > { %s2247_s22 = scalar_lea.sflag %s2060_s13, 6 [#allocation3]  ;;  %s1463_s0 = sshra.s32 %s318_s7, 4  ;;  %s1464_s0 = int_to_ptr.hbm [resolvable:$true] %s1463_s0 }
  0xd2   : > { %s1465_s21 = scalar_lea.hbm %s1464_s0, 1  ;;  %p1470_p12 = scmp.lt.s32.totalorder %s1464_s0, %s2713_s1 }
  0xd3   : > { %p1466_p5 = scmp.ne.s32.totalorder %s1464_s0, %s1465_s21  ;;  %p1471_p13 = scmp.lt.s32.totalorder %s2092_s27, %s1465_s21 }
  0xd5   : > { %p1467_p6 = pnand %p1466_p5, %p1259_p0  ;;  %p1472_p1 = por %p1471_p13, %p1470_p12 }
  0xd7   : > { %p1468_p11 = pneg %p1467_p6 }
  0xd9   : > { %p1473_p2 = pnand %p1472_p1, %p1468_p11 }
  0xdb   : > { %1476 = shalt.err (!%p1473_p2)  }
  0xdc   : > { %s2790_s6 = sld [smem:[#allocation83_spill]] }
  0xe2   : > { %s2791_s19 = int_to_ptr.vmem [resolvable:$true] %s2790_s6 }
  0xe3   : > { %s1477_s18 = sshra.s32 %s2791_s19, 4  ;;  %s1478_s18 = int_to_ptr.vmem [resolvable:$true] %s1477_s18 }
  0xe4   : > { %s1479_s12 = scalar_lea.vmem %s1478_s18, 1  ;;  %p1484_p10 = scmp.lt.s32.totalorder %s1478_s18, [#allocation2] }
  0xe5   : > { %p1480_p4 = scmp.ne.s32.totalorder %s1478_s18, %s1479_s12  ;;  %p1485_p8 = scmp.lt.s32.totalorder %s2101_s17, %s1479_s12 }
  0xe7   : > { %p1481_p7 = pnand %p1480_p4, %p1259_p0  ;;  %p1486_p5 = por %p1485_p8, %p1484_p10 }
  0xe9   : > { %p1482_p9 = pneg %p1481_p7 }
  0xeb   : > { %p1487_p6 = pnand %p1486_p5, %p1482_p9 }
  0xed   : > { %1490 = shalt.err (!%p1487_p6)  }
  0xee   : > { %s2792_s23 = smov %s2791_s19  ;;  %p325_p11 = scmp.gt.s32.totalorder %s2231_s8, 0 }
  0xef   : > { %1218 = dma.hbm_to_vmem [thread:$0]  (%p1259_p0), %s318_s7, 16, %s2792_s23, %s2169_s29 }
  0xf0   : > { %p1062_p12 = scmp.lt.s32.totalorder %s2231_s8, 63  ;;  %s2867_s8 = smov (!%p325_p11, %s2231_s8), 0 }
  0xf1   : > { %s1222_s0 = scalar_select %p1259_p0, [#allocation5], [#allocation48] }
  0xf2   : > { %s2869_s10 = smov (!%p1259_p0, %s346_s10), 0  ;;  %s2871_s8 = smov (!%p1062_p12, %s2867_s8), 63 }
  0xf3   : > { %s2274_s21 = sld [smem:[%s1222_s0 + %s2869_s10]]  ;;  %s2278_s4 = sshll.u32 %s883_s9, 4 }
  0xf4   : > { %2793 = sst [smem:[#allocation83_spill]] %s2278_s4  ;;  %s329_s7 = scalar_lea.hbm %s2713_s1, %s2871_s8 }
  0xf5   : > { %s340_s18 = sshll.u32 %s329_s7, 4  ;;  %s369_s12 = sadd.s32 7, %s2039_s15  ;;  %s341_s18 = int_to_ptr.hbm [resolvable:$true] %s340_s18 }
  0xf6   : > { %s890_s23 = scalar_lea.vmem %s2050_s30, 7 [#allocation2]  ;;  %s1491_s28 = sshra.s32 %s341_s18, 4  ;;  %s1492_s28 = int_to_ptr.hbm [resolvable:$true] %s1491_s28 }
  0xf7   : > { %s1493_s5 = scalar_lea.hbm %s1492_s28, 1  ;;  %p1498_p4 = scmp.lt.s32.totalorder %s1492_s28, %s2713_s1 }
  0xf8   : > { %p1494_p13 = scmp.ne.s32.totalorder %s1492_s28, %s1493_s5  ;;  %p1499_p7 = scmp.lt.s32.totalorder %s2092_s27, %s1493_s5 }
  0xfa   : > { %p1495_p1 = pnand %p1494_p13, %p1259_p0  ;;  %p1500_p9 = por %p1499_p7, %p1498_p4 }
  0xfc   : > { %p1496_p2 = pneg %p1495_p1 }
  0xfe   : > { %p1501_p10 = pnand %p1500_p9, %p1496_p2 }
 0x100   : > { %1504 = shalt.err (!%p1501_p10)  }
 0x101   : > { %s2794_s8 = sld [smem:[#allocation82_spill]] }
 0x107   : > { %s2795_s0 = int_to_ptr.vmem [resolvable:$true] %s2794_s8 }
 0x108   : > { %s1505_s6 = sshra.s32 %s2795_s0, 4  ;;  %s1506_s6 = int_to_ptr.vmem [resolvable:$true] %s1505_s6 }
 0x109   : > { %s1507_s19 = scalar_lea.vmem %s1506_s6, 1  ;;  %p1512_p11 = scmp.lt.s32.totalorder %s1506_s6, [#allocation2] }
 0x10a   : > { %p1508_p8 = scmp.ne.s32.totalorder %s1506_s6, %s1507_s19  ;;  %p1513_p12 = scmp.lt.s32.totalorder %s2101_s17, %s1507_s19 }
 0x10c   : > { %p1509_p5 = pnand %p1508_p8, %p1259_p0  ;;  %p1514_p13 = por %p1513_p12, %p1512_p11 }
 0x10e   : > { %p1510_p6 = pneg %p1509_p5 }
 0x110   : > { %p1515_p1 = pnand %p1514_p13, %p1510_p6 }
 0x112   : > { %1518 = shalt.err (!%p1515_p1)  }
 0x113   : > { %s2796_s5 = smov %s2795_s0  ;;  %p348_p2 = scmp.gt.s32.totalorder %s2274_s21, 0 }
 0x114   : > { %1221 = dma.hbm_to_vmem [thread:$0]  (%p1259_p0), %s341_s18, 16, %s2796_s5, %s2234_s24 }
 0x115   : > { %s1225_s28 = scalar_select %p1259_p0, [#allocation5], [#allocation49] }
 0x116   : > { %p1069_p4 = scmp.lt.s32.totalorder %s2274_s21, 63  ;;  %s2873_s12 = smov (!%p1259_p0, %s369_s12), 0 }
 0x117   : > { %s2875_s21 = smov (!%p348_p2, %s2274_s21), 0  ;;  %s2309_s7 = sld [smem:[%s1225_s28 + %s2873_s12]] }
 0x118   : > { %s2312_s10 = scalar_lea.sflag %s2060_s13, 7 [#allocation3]  ;;  %s2877_s21 = smov (!%p1069_p4, %s2875_s21), 63 }
 0x119   : > { %2797 = sst [smem:[#allocation82_spill]] %s2312_s10  ;;  %s2316_s9 = sshll.u32 %s890_s23, 4 }
 0x11a   : > { %2798 = sst [smem:[#allocation84_spill]] %s2316_s9  ;;  %s392_s8 = sadd.s32 1, %s1895_s25 }
 0x11b   : > { %s352_s6 = scalar_lea.hbm %s2713_s1, %s2877_s21  ;;  %p2323_p7 = scmp.lt.s32.totalorder %s392_s8, 2 }
 0x11c   : > { %s363_s19 = sshll.u32 %s352_s6, 4  ;;  %s364_s19 = int_to_ptr.hbm [resolvable:$true] %s363_s19 }
 0x11d   : > { %s1519_s12 = sshra.s32 %s364_s19, 4  ;;  %s1520_s12 = int_to_ptr.hbm [resolvable:$true] %s1519_s12 }
 0x11e   : > { %s1521_s28 = scalar_lea.hbm %s1520_s12, 1  ;;  %p1526_p5 = scmp.lt.s32.totalorder %s1520_s12, %s2713_s1 }
 0x11f   : > { %p1522_p9 = scmp.ne.s32.totalorder %s1520_s12, %s1521_s28  ;;  %p1527_p6 = scmp.lt.s32.totalorder %s2092_s27, %s1521_s28 }
 0x121   : > { %p1523_p10 = pnand %p1522_p9, %p1259_p0  ;;  %p1528_p11 = por %p1527_p6, %p1526_p5 }
 0x123   : > { %p1524_p8 = pneg %p1523_p10 }
 0x125   : > { %p1529_p12 = pnand %p1528_p11, %p1524_p8 }
 0x127   : > { %1532 = shalt.err (!%p1529_p12)  }
 0x128   : > { %s2800_s21 = sld [smem:[#allocation83_spill]] }
 0x12e   : > { %s2801_s8 = int_to_ptr.vmem [resolvable:$true] %s2800_s21 }
 0x12f   : > { %s1533_s18 = sshra.s32 %s2801_s8, 4  ;;  %s1534_s18 = int_to_ptr.vmem [resolvable:$true] %s1533_s18 }
 0x130   : > { %s1535_s0 = scalar_lea.vmem %s1534_s18, 1  ;;  %p1540_p4 = scmp.lt.s32.totalorder %s1534_s18, [#allocation2] }
 0x131   : > { %p1536_p13 = scmp.ne.s32.totalorder %s1534_s18, %s1535_s0  ;;  %p1541_p9 = scmp.lt.s32.totalorder %s2101_s17, %s1535_s0 }
 0x133   : > { %p1537_p1 = pnand %p1536_p13, %p1259_p0  ;;  %p1542_p10 = por %p1541_p9, %p1540_p4 }
 0x135   : > { %p1538_p2 = pneg %p1537_p1 }
 0x137   : > { %p1543_p3 = pnand %p1542_p10, %p1538_p2 }
 0x139   : > { %1546 = shalt.err (!%p1543_p3)  }
 0x13a   : > { %s2802_s4 = smov %s2801_s8  ;;  %p371_p8 = scmp.gt.s32.totalorder %s2309_s7, 0 }
 0x13b   : > { %1224 = dma.hbm_to_vmem [thread:$0]  (%p1259_p0), %s364_s19, 16, %s2802_s4, %s2247_s22 }
 0x13c   : > { %p1076_p5 = scmp.lt.s32.totalorder %s2309_s7, 63  ;;  %s398_s6 = ssub.s32 1, %s2837_s26 }
 0x13d   : > { %s2347_s12 = sadd.s32 8, %s2039_s15  ;;  %s2879_s7 = smov (!%p371_p8, %s2309_s7), 0 }
 0x13e   : > { %s1229_s28 = scalar_select %p2323_p7, [#allocation5], [#allocation50] }
 0x13f   : > { %s2881_s7 = smov (!%p1076_p5, %s2879_s7), 63  ;;  %s2358_s0 = sshll.u32 %s398_s6, 3 }
 0x140   : > { %s1230_s23 = scalar_select %p2323_p7, %s2347_s12, 0 }
 0x141   : > { %s375_s18 = scalar_lea.hbm %s2713_s1, %s2881_s7 }
 0x142   : > { %s386_s19 = sshll.u32 %s375_s18, 4  ;;  %s2360_s4 = sld [smem:[%s1229_s28 + %s1230_s23]]  ;;  %s387_s19 = int_to_ptr.hbm [resolvable:$true] %s386_s19 }
 0x143   : > { %s1547_s26 = sshra.s32 %s387_s19, 4  ;;  %s1548_s26 = int_to_ptr.hbm [resolvable:$true] %s1547_s26 }
 0x144   : > { %s1549_s9 = scalar_lea.hbm %s1548_s26, 1  ;;  %p1554_p12 = scmp.lt.s32.totalorder %s1548_s26, %s2713_s1 }
 0x145   : > { %p1550_p3 = scmp.ne.s32.totalorder %s1548_s26, %s1549_s9  ;;  %p1555_p13 = scmp.lt.s32.totalorder %s2092_s27, %s1549_s9 }
 0x147   : > { %p1551_p6 = pnand %p1550_p3, %p1259_p0  ;;  %p1556_p1 = por %p1555_p13, %p1554_p12 }
 0x149   : > { %p1552_p11 = pneg %p1551_p6 }
 0x14b   : > { %p1557_p2 = pnand %p1556_p1, %p1552_p11 }
 0x14d   : > { %1560 = shalt.err (!%p1557_p2)  }
 0x14e   : > { %s2803_s7 = sld [smem:[#allocation84_spill]] }
 0x154   : > { %s2804_s6 = int_to_ptr.vmem [resolvable:$true] %s2803_s7 }
 0x155   : > { %s1561_s28 = sshra.s32 %s2804_s6, 4  ;;  %s1562_s28 = int_to_ptr.vmem [resolvable:$true] %s1561_s28 }
 0x156   : > { %s1563_s23 = scalar_lea.vmem %s1562_s28, 1  ;;  %p1568_p8 = scmp.lt.s32.totalorder %s1562_s28, [#allocation2] }
 0x157   : > { %p1564_p4 = scmp.ne.s32.totalorder %s1562_s28, %s1563_s23  ;;  %p1569_p5 = scmp.lt.s32.totalorder %s2101_s17, %s1563_s23 }
 0x159   : > { %p1565_p9 = pnand %p1564_p4, %p1259_p0  ;;  %p1570_p3 = por %p1569_p5, %p1568_p8 }
 0x15b   : > { %p1566_p10 = pneg %p1565_p9 }
 0x15d   : > { %p1571_p6 = pnand %p1570_p3, %p1566_p10 }
 0x15f   : > { %1574 = shalt.err (!%p1571_p6)  }
 0x160   : > { %s2805_s3 = smov %s2804_s6  ;;  %s2379_s15 = scalar_lea.vmem [#allocation2], %s2358_s0 }
 0x161   : > { %1227 = dma.hbm_to_vmem [thread:$0]  (%p1259_p0), %s387_s19, 16, %s2805_s3, %s2312_s10 }
 0x162   : > { %s418_s9 = sshll.u32 %s2379_s15, 4  ;;  %s422_s21 = sadd.s32 1, %s2347_s12  ;;  %s2393_s9 = int_to_ptr.vmem [resolvable:$true] %s418_s9 }
 0x163   : > { %s1232_s25 = scalar_select %p2323_p7, [#allocation5], [#allocation51] }
 0x164   : > { %p401_p11 = scmp.gt.s32.totalorder %s2360_s4, 0  ;;  %p1085_p12 = scmp.lt.s32.totalorder %s2360_s4, 63 }
 0x165   : > { %s2883_s21 = smov (!%p2323_p7, %s422_s21), 0  ;;  %s902_s18 = scalar_lea.vmem %s2379_s15, 1 [#allocation2] }
 0x166   : > { %s2885_s4 = smov (!%p401_p11, %s2360_s4), 0  ;;  %s2390_s8 = sld [smem:[%s1232_s25 + %s2883_s21]] }
 0x167   : > { %s2887_s4 = smov (!%p1085_p12, %s2885_s4), 63  ;;  %s2398_s6 = sshll.u32 %s902_s18, 4  ;;  %s442_s6 = int_to_ptr.vmem [resolvable:$true] %s2398_s6 }
 0x168   : > { %s405_s7 = scalar_lea.hbm %s2713_s1, %s2887_s4  ;;  %s445_s23 = sadd.s32 2, %s2347_s12 }
 0x169   : > { %s2400_s28 = sshll.u32 %s405_s7, 4  ;;  %s909_s3 = scalar_lea.vmem %s2379_s15, 2 [#allocation2]  ;;  %s417_s28 = int_to_ptr.hbm [resolvable:$true] %s2400_s28 }
 0x16a   : > { %s2406_s11 = scalar_lea.sflag [#allocation3], %s2358_s0  ;;  %s1575_s21 = sshra.s32 %s417_s28, 4  ;;  %s1576_s21 = int_to_ptr.hbm [resolvable:$true] %s1575_s21 }
 0x16b   : > { %s1577_s25 = scalar_lea.hbm %s1576_s21, 1  ;;  %p1582_p2 = scmp.lt.s32.totalorder %s1576_s21, %s2713_s1 }
 0x16c   : > { %p1578_p0 = scmp.ne.s32.totalorder %s1576_s21, %s1577_s25  ;;  %p1583_p4 = scmp.lt.s32.totalorder %s2092_s27, %s1577_s25 }
 0x16e   : > { %p1579_p13 = pnand %p1578_p0, %p2323_p7  ;;  %p1584_p9 = por %p1583_p4, %p1582_p2 }
 0x170   : > { %p1580_p1 = pneg %p1579_p13 }
 0x172   : > { %p1585_p10 = pnand %p1584_p9, %p1580_p1 }
 0x174   : > { %1588 = shalt.err (!%p1585_p10)  }
 0x175   : > { %s1589_s0 = sshra.s32 %s2393_s9, 4  ;;  %s1590_s0 = int_to_ptr.vmem [resolvable:$true] %s1589_s0 }
 0x176   : > { %s1591_s4 = scalar_lea.vmem %s1590_s0, 1  ;;  %p1596_p6 = scmp.lt.s32.totalorder %s1590_s0, [#allocation2] }
 0x177   : > { %p1592_p8 = scmp.ne.s32.totalorder %s1590_s0, %s1591_s4  ;;  %p1597_p11 = scmp.lt.s32.totalorder %s2101_s17, %s1591_s4 }
 0x179   : > { %p1593_p5 = pnand %p1592_p8, %p2323_p7  ;;  %p1598_p12 = por %p1597_p11, %p1596_p6 }
 0x17b   : > { %p1594_p3 = pneg %p1593_p5 }
 0x17d   : > { %p1599_p0 = pnand %p1598_p12, %p1594_p3 }
 0x17f   : > { %1602 = shalt.err (!%p1599_p0)  }
 0x180   : > { %1231 = dma.hbm_to_vmem [thread:$0]  (%p2323_p7), %s417_s28, 16, %s2393_s9, %s2406_s11 }
 0x181   : > { %p424_p13 = scmp.gt.s32.totalorder %s2390_s8, 0  ;;  %p1091_p1 = scmp.lt.s32.totalorder %s2390_s8, 63 }
 0x182   : > { %s1235_s30 = scalar_select %p2323_p7, [#allocation5], [#allocation52] }
 0x183   : > { %s2889_s8 = smov (!%p424_p13, %s2390_s8), 0  ;;  %s2891_s23 = smov (!%p2323_p7, %s445_s23), 0 }
 0x184   : > { %s2893_s8 = smov (!%p1091_p1, %s2889_s8), 63  ;;  %s905_s18 = scalar_lea.sflag %s2406_s11, 1 [#allocation3] }
 0x185   : > { %s2432_s26 = sld [smem:[%s1235_s30 + %s2891_s23]]  ;;  %s428_s25 = scalar_lea.hbm %s2713_s1, %s2893_s8 }
 0x186   : > { %s439_s9 = sshll.u32 %s428_s25, 4  ;;  %s2440_s28 = sshll.u32 %s909_s3, 4  ;;  %s440_s9 = int_to_ptr.hbm [resolvable:$true] %s439_s9  ;;  %s465_s28 = int_to_ptr.vmem [resolvable:$true] %s2440_s28 }
 0x187   : > { %s468_s19 = sadd.s32 3, %s2347_s12  ;;  %s1603_s0 = sshra.s32 %s440_s9, 4  ;;  %s1604_s0 = int_to_ptr.hbm [resolvable:$true] %s1603_s0 }
 0x188   : > { %s1605_s4 = scalar_lea.hbm %s1604_s0, 1  ;;  %p1610_p10 = scmp.lt.s32.totalorder %s1604_s0, %s2713_s1 }
 0x189   : > { %p1606_p2 = scmp.ne.s32.totalorder %s1604_s0, %s1605_s4  ;;  %p1611_p8 = scmp.lt.s32.totalorder %s2092_s27, %s1605_s4 }
 0x18b   : > { %p1607_p4 = pnand %p1606_p2, %p2323_p7  ;;  %p1612_p5 = por %p1611_p8, %p1610_p10 }
 0x18d   : > { %p1608_p9 = pneg %p1607_p4 }
 0x18f   : > { %p1613_p3 = pnand %p1612_p5, %p1608_p9 }
 0x191   : > { %1616 = shalt.err (!%p1613_p3)  }
 0x192   : > { %s1617_s8 = sshra.s32 %s442_s6, 4  ;;  %s1618_s8 = int_to_ptr.vmem [resolvable:$true] %s1617_s8 }
 0x193   : > { %s1619_s3 = scalar_lea.vmem %s1618_s8, 1  ;;  %p1624_p0 = scmp.lt.s32.totalorder %s1618_s8, [#allocation2] }
 0x194   : > { %p1620_p6 = scmp.ne.s32.totalorder %s1618_s8, %s1619_s3  ;;  %p1625_p13 = scmp.lt.s32.totalorder %s2101_s17, %s1619_s3 }
 0x196   : > { %p1621_p11 = pnand %p1620_p6, %p2323_p7  ;;  %p1626_p1 = por %p1625_p13, %p1624_p0 }
 0x198   : > { %p1622_p12 = pneg %p1621_p11 }
 0x19a   : > { %p1627_p2 = pnand %p1626_p1, %p1622_p12 }
 0x19c   : > { %1630 = shalt.err (!%p1627_p2)  }
 0x19d   : > { %1234 = dma.hbm_to_vmem [thread:$0]  (%p2323_p7), %s440_s9, 16, %s442_s6, %s905_s18 }
 0x19e   : > { %s1238_s7 = scalar_select %p2323_p7, [#allocation5], [#allocation53] }
 0x19f   : > { %p447_p4 = scmp.gt.s32.totalorder %s2432_s26, 0  ;;  %p1098_p9 = scmp.lt.s32.totalorder %s2432_s26, 63 }
 0x1a0   : > { %s2895_s19 = smov (!%p2323_p7, %s468_s19), 0  ;;  %s916_s25 = scalar_lea.vmem %s2379_s15, 3 [#allocation2] }
 0x1a1   : > { %s2897_s26 = smov (!%p447_p4, %s2432_s26), 0  ;;  %s2463_s21 = sld [smem:[%s1238_s7 + %s2895_s19]] }
 0x1a2   : > { %s2899_s26 = smov (!%p1098_p9, %s2897_s26), 63  ;;  %s912_s0 = scalar_lea.sflag %s2406_s11, 2 [#allocation3] }
 0x1a3   : > { %s451_s6 = scalar_lea.hbm %s2713_s1, %s2899_s26  ;;  %s2471_s18 = sshll.u32 %s916_s25, 4  ;;  %s488_s18 = int_to_ptr.vmem [resolvable:$true] %s2471_s18 }
 0x1a4   : > { %s462_s9 = sshll.u32 %s451_s6, 4  ;;  %s491_s30 = sadd.s32 4, %s2347_s12  ;;  %s463_s9 = int_to_ptr.hbm [resolvable:$true] %s462_s9 }
 0x1a5   : > { %s923_s8 = scalar_lea.vmem %s2379_s15, 4 [#allocation2]  ;;  %s1631_s3 = sshra.s32 %s463_s9, 4  ;;  %s1632_s3 = int_to_ptr.hbm [resolvable:$true] %s1631_s3 }
 0x1a6   : > { %s1633_s10 = scalar_lea.hbm %s1632_s3, 1  ;;  %p1638_p3 = scmp.lt.s32.totalorder %s1632_s3, %s2713_s1 }
 0x1a7   : > { %p1634_p10 = scmp.ne.s32.totalorder %s1632_s3, %s1633_s10  ;;  %p1639_p6 = scmp.lt.s32.totalorder %s2092_s27, %s1633_s10 }
 0x1a9   : > { %p1635_p8 = pnand %p1634_p10, %p2323_p7  ;;  %p1640_p11 = por %p1639_p6, %p1638_p3 }
 0x1ab   : > { %p1636_p5 = pneg %p1635_p8 }
 0x1ad   : > { %p1641_p12 = pnand %p1640_p11, %p1636_p5 }
 0x1af   : > { %1644 = shalt.err (!%p1641_p12)  }
 0x1b0   : > { %s1645_s26 = sshra.s32 %s465_s28, 4  ;;  %s1646_s26 = int_to_ptr.vmem [resolvable:$true] %s1645_s26 }
 0x1b1   : > { %s1647_s25 = scalar_lea.vmem %s1646_s26, 1  ;;  %p1652_p2 = scmp.lt.s32.totalorder %s1646_s26, [#allocation2] }
 0x1b2   : > { %p1648_p0 = scmp.ne.s32.totalorder %s1646_s26, %s1647_s25  ;;  %p1653_p4 = scmp.lt.s32.totalorder %s2101_s17, %s1647_s25 }
 0x1b4   : > { %p1649_p13 = pnand %p1648_p0, %p2323_p7  ;;  %p1654_p9 = por %p1653_p4, %p1652_p2 }
 0x1b6   : > { %p1650_p1 = pneg %p1649_p13 }
 0x1b8   : > { %p1655_p10 = pnand %p1654_p9, %p1650_p1 }
 0x1ba   : > { %1658 = shalt.err (!%p1655_p10)  }
 0x1bb   : > { %1237 = dma.hbm_to_vmem [thread:$0]  (%p2323_p7), %s463_s9, 16, %s465_s28, %s912_s0 }
 0x1bc   : > { %p470_p8 = scmp.gt.s32.totalorder %s2463_s21, 0  ;;  %p1105_p5 = scmp.lt.s32.totalorder %s2463_s21, 63 }
 0x1bd   : > { %s1241_s10 = scalar_select %p2323_p7, [#allocation5], [#allocation54] }
 0x1be   : > { %s2901_s21 = smov (!%p470_p8, %s2463_s21), 0  ;;  %s2903_s30 = smov (!%p2323_p7, %s491_s30), 0 }
 0x1bf   : > { %s2905_s21 = smov (!%p1105_p5, %s2901_s21), 63  ;;  %s919_s4 = scalar_lea.sflag %s2406_s11, 3 [#allocation3] }
 0x1c0   : > { %s2502_s23 = sld [smem:[%s1241_s10 + %s2903_s30]]  ;;  %s474_s19 = scalar_lea.hbm %s2713_s1, %s2905_s21 }
 0x1c1   : > { %s485_s28 = sshll.u32 %s474_s19, 4  ;;  %s2510_s0 = sshll.u32 %s923_s8, 4  ;;  %s486_s28 = int_to_ptr.hbm [resolvable:$true] %s485_s28  ;;  %s511_s0 = int_to_ptr.vmem [resolvable:$true] %s2510_s0 }
 0x1c2   : > { %s514_s9 = sadd.s32 5, %s2347_s12  ;;  %s1659_s7 = sshra.s32 %s486_s28, 4  ;;  %s1660_s7 = int_to_ptr.hbm [resolvable:$true] %s1659_s7 }
 0x1c3   : > { %s1661_s26 = scalar_lea.hbm %s1660_s7, 1  ;;  %p1666_p12 = scmp.lt.s32.totalorder %s1660_s7, %s2713_s1 }
 0x1c4   : > { %p1662_p3 = scmp.ne.s32.totalorder %s1660_s7, %s1661_s26  ;;  %p1667_p0 = scmp.lt.s32.totalorder %s2092_s27, %s1661_s26 }
 0x1c6   : > { %p1663_p6 = pnand %p1662_p3, %p2323_p7  ;;  %p1668_p13 = por %p1667_p0, %p1666_p12 }
 0x1c8   : > { %p1664_p11 = pneg %p1663_p6 }
 0x1ca   : > { %p1669_p1 = pnand %p1668_p13, %p1664_p11 }
 0x1cc   : > { %1672 = shalt.err (!%p1669_p1)  }
 0x1cd   : > { %s1673_s21 = sshra.s32 %s488_s18, 4  ;;  %s1674_s21 = int_to_ptr.vmem [resolvable:$true] %s1673_s21 }
 0x1ce   : > { %s1675_s8 = scalar_lea.vmem %s1674_s21, 1  ;;  %p1680_p10 = scmp.lt.s32.totalorder %s1674_s21, [#allocation2] }
 0x1cf   : > { %p1676_p2 = scmp.ne.s32.totalorder %s1674_s21, %s1675_s8  ;;  %p1681_p8 = scmp.lt.s32.totalorder %s2101_s17, %s1675_s8 }
 0x1d1   : > { %p1677_p4 = pnand %p1676_p2, %p2323_p7  ;;  %p1682_p5 = por %p1681_p8, %p1680_p10 }
 0x1d3   : > { %p1678_p9 = pneg %p1677_p4 }
 0x1d5   : > { %p1683_p3 = pnand %p1682_p5, %p1678_p9 }
 0x1d7   : > { %1686 = shalt.err (!%p1683_p3)  }
 0x1d8   : > { %1240 = dma.hbm_to_vmem [thread:$0]  (%p2323_p7), %s486_s28, 16, %s488_s18, %s919_s4 }
 0x1d9   : > { %s1244_s10 = scalar_select %p2323_p7, [#allocation5], [#allocation55] }
 0x1da   : > { %p493_p6 = scmp.gt.s32.totalorder %s2502_s23, 0  ;;  %p1112_p11 = scmp.lt.s32.totalorder %s2502_s23, 63 }
 0x1db   : > { %s2907_s9 = smov (!%p2323_p7, %s514_s9), 0  ;;  %s930_s3 = scalar_lea.vmem %s2379_s15, 5 [#allocation2] }
 0x1dc   : > { %s2909_s23 = smov (!%p493_p6, %s2502_s23), 0  ;;  %s2533_s6 = sld [smem:[%s1244_s10 + %s2907_s9]] }
 0x1dd   : > { %s2911_s23 = smov (!%p1112_p11, %s2909_s23), 63  ;;  %s926_s19 = scalar_lea.sflag %s2406_s11, 4 [#allocation3] }
 0x1de   : > { %s497_s30 = scalar_lea.hbm %s2713_s1, %s2911_s23  ;;  %s2541_s4 = sshll.u32 %s930_s3, 4  ;;  %s534_s4 = int_to_ptr.vmem [resolvable:$true] %s2541_s4 }
 0x1df   : > { %s508_s18 = sshll.u32 %s497_s30, 4  ;;  %s537_s28 = sadd.s32 6, %s2347_s12  ;;  %s509_s18 = int_to_ptr.hbm [resolvable:$true] %s508_s18 }
 0x1e0   : > { %s1687_s25 = sshra.s32 %s509_s18, 4  ;;  %s1688_s25 = int_to_ptr.hbm [resolvable:$true] %s1687_s25 }
 0x1e1   : > { %s1689_s21 = scalar_lea.hbm %s1688_s25, 1  ;;  %p1694_p1 = scmp.lt.s32.totalorder %s1688_s25, %s2713_s1 }
 0x1e2   : > { %p1690_p12 = scmp.ne.s32.totalorder %s1688_s25, %s1689_s21  ;;  %p1695_p2 = scmp.lt.s32.totalorder %s2092_s27, %s1689_s21 }
 0x1e4   : > { %p1691_p0 = pnand %p1690_p12, %p2323_p7  ;;  %p1696_p4 = por %p1695_p2, %p1694_p1 }
 0x1e6   : > { %p1692_p13 = pneg %p1691_p0 }
 0x1e8   : > { %p1697_p9 = pnand %p1696_p4, %p1692_p13 }
 0x1ea   : > { %1700 = shalt.err (!%p1697_p9)  }
 0x1eb   : > { %s1701_s23 = sshra.s32 %s511_s0, 4  ;;  %s1702_s23 = int_to_ptr.vmem [resolvable:$true] %s1701_s23 }
 0x1ec   : > { %s1703_s10 = scalar_lea.vmem %s1702_s23, 1  ;;  %p1708_p3 = scmp.lt.s32.totalorder %s1702_s23, [#allocation2] }
 0x1ed   : > { %p1704_p10 = scmp.ne.s32.totalorder %s1702_s23, %s1703_s10  ;;  %p1709_p6 = scmp.lt.s32.totalorder %s2101_s17, %s1703_s10 }
 0x1ef   : > { %p1705_p8 = pnand %p1704_p10, %p2323_p7  ;;  %p1710_p11 = por %p1709_p6, %p1708_p3 }
 0x1f1   : > { %p1706_p5 = pneg %p1705_p8 }
 0x1f3   : > { %p1711_p12 = pnand %p1710_p11, %p1706_p5 }
 0x1f5   : > { %1714 = shalt.err (!%p1711_p12)  }
 0x1f6   : > { %1243 = dma.hbm_to_vmem [thread:$0]  (%p2323_p7), %s509_s18, 16, %s511_s0, %s926_s19 }
 0x1f7   : > { %p516_p0 = scmp.gt.s32.totalorder %s2533_s6, 0  ;;  %p1119_p13 = scmp.lt.s32.totalorder %s2533_s6, 63 }
 0x1f8   : > { %s1247_s3 = scalar_select %p2323_p7, [#allocation5], [#allocation56] }
 0x1f9   : > { %s2913_s6 = smov (!%p516_p0, %s2533_s6), 0  ;;  %s2915_s28 = smov (!%p2323_p7, %s537_s28), 0 }
 0x1fa   : > { %s2917_s6 = smov (!%p1119_p13, %s2913_s6), 63  ;;  %s933_s7 = scalar_lea.sflag %s2406_s11, 5 [#allocation3] }
 0x1fb   : > { %s2565_s26 = sld [smem:[%s1247_s3 + %s2915_s28]]  ;;  %s520_s21 = scalar_lea.hbm %s2713_s1, %s2917_s6 }
 0x1fc   : > { %s531_s9 = sshll.u32 %s520_s21, 4  ;;  %s937_s0 = scalar_lea.vmem %s2379_s15, 6 [#allocation2]  ;;  %s532_s9 = int_to_ptr.hbm [resolvable:$true] %s531_s9 }
 0x1fd   : > { %s560_s19 = sadd.s32 7, %s2347_s12  ;;  %s1715_s18 = sshra.s32 %s532_s9, 4  ;;  %s1716_s18 = int_to_ptr.hbm [resolvable:$true] %s1715_s18 }
 0x1fe   : > { %s1717_s8 = scalar_lea.hbm %s1716_s18, 1  ;;  %p1722_p9 = scmp.lt.s32.totalorder %s1716_s18, %s2713_s1 }
 0x1ff   : > { %p1718_p1 = scmp.ne.s32.totalorder %s1716_s18, %s1717_s8  ;;  %p1723_p10 = scmp.lt.s32.totalorder %s2092_s27, %s1717_s8 }
 0x201   : > { %p1719_p2 = pnand %p1718_p1, %p2323_p7  ;;  %p1724_p8 = por %p1723_p10, %p1722_p9 }
 0x203   : > { %p1720_p4 = pneg %p1719_p2 }
 0x205   : > { %p1725_p5 = pnand %p1724_p8, %p1720_p4 }
 0x207   : > { %1728 = shalt.err (!%p1725_p5)  }
 0x208   : > { %s1729_s6 = sshra.s32 %s534_s4, 4  ;;  %s1730_s6 = int_to_ptr.vmem [resolvable:$true] %s1729_s6 }
 0x209   : > { %s1731_s12 = scalar_lea.vmem %s1730_s6, 1  ;;  %p1736_p12 = scmp.lt.s32.totalorder %s1730_s6, [#allocation2] }
 0x20a   : > { %p1732_p3 = scmp.ne.s32.totalorder %s1730_s6, %s1731_s12  ;;  %p1737_p0 = scmp.lt.s32.totalorder %s2101_s17, %s1731_s12 }
 0x20c   : > { %p1733_p6 = pnand %p1732_p3, %p2323_p7  ;;  %p1738_p13 = por %p1737_p0, %p1736_p12 }
 0x20e   : > { %p1734_p11 = pneg %p1733_p6 }
 0x210   : > { %p1739_p1 = pnand %p1738_p13, %p1734_p11 }
 0x212   : > { %1742 = shalt.err (!%p1739_p1)  }
 0x213   : > { %1246 = dma.hbm_to_vmem [thread:$0]  (%p2323_p7), %s532_s9, 16, %s534_s4, %s933_s7 }
 0x214   : > { %s1250_s28 = scalar_select %p2323_p7, [#allocation5], [#allocation57] }
 0x215   : > { %p539_p2 = scmp.gt.s32.totalorder %s2565_s26, 0  ;;  %p1126_p4 = scmp.lt.s32.totalorder %s2565_s26, 63 }
 0x216   : > { %s2919_s19 = smov (!%p2323_p7, %s560_s19), 0  ;;  %s2595_s3 = sshll.u32 %s937_s0, 4  ;;  %s557_s3 = int_to_ptr.vmem [resolvable:$true] %s2595_s3 }
 0x217   : > { %s2921_s26 = smov (!%p539_p2, %s2565_s26), 0  ;;  %s2597_s30 = sld [smem:[%s1250_s28 + %s2919_s19]] }
 0x218   : > { %s2923_s26 = smov (!%p1126_p4, %s2921_s26), 63  ;;  %s940_s25 = scalar_lea.sflag %s2406_s11, 6 [#allocation3] }
 0x219   : > { %s543_s4 = scalar_lea.hbm %s2713_s1, %s2923_s26  ;;  %s944_s9 = scalar_lea.vmem %s2379_s15, 7 [#allocation2] }
 0x21a   : > { %s554_s7 = sshll.u32 %s543_s4, 4  ;;  %s555_s7 = int_to_ptr.hbm [resolvable:$true] %s554_s7 }
 0x21b   : > { %s1743_s8 = sshra.s32 %s555_s7, 4  ;;  %s1744_s8 = int_to_ptr.hbm [resolvable:$true] %s1743_s8 }
 0x21c   : > { %s1745_s23 = scalar_lea.hbm %s1744_s8, 1  ;;  %p1750_p5 = scmp.lt.s32.totalorder %s1744_s8, %s2713_s1 }
 0x21d   : > { %p1746_p9 = scmp.ne.s32.totalorder %s1744_s8, %s1745_s23  ;;  %p1751_p3 = scmp.lt.s32.totalorder %s2092_s27, %s1745_s23 }
 0x21f   : > { %p1747_p10 = pnand %p1746_p9, %p2323_p7  ;;  %p1752_p6 = por %p1751_p3, %p1750_p5 }
 0x221   : > { %p1748_p8 = pneg %p1747_p10 }
 0x223   : > { %p1753_p11 = pnand %p1752_p6, %p1748_p8 }
 0x225   : > { %1756 = shalt.err (!%p1753_p11)  }
 0x226   : > { %s1757_s26 = sshra.s32 %s557_s3, 4  ;;  %s1758_s26 = int_to_ptr.vmem [resolvable:$true] %s1757_s26 }
 0x227   : > { %s1759_s15 = scalar_lea.vmem %s1758_s26, 1  ;;  %p1764_p1 = scmp.lt.s32.totalorder %s1758_s26, [#allocation2] }
 0x228   : > { %p1760_p12 = scmp.ne.s32.totalorder %s1758_s26, %s1759_s15  ;;  %p1765_p2 = scmp.lt.s32.totalorder %s2101_s17, %s1759_s15 }
 0x22a   : > { %p1761_p0 = pnand %p1760_p12, %p2323_p7  ;;  %p1766_p4 = por %p1765_p2, %p1764_p1 }
 0x22c   : > { %p1762_p13 = pneg %p1761_p0 }
 0x22e   : > { %p1767_p9 = pnand %p1766_p4, %p1762_p13 }
 0x230   : > { %1770 = shalt.err (!%p1767_p9)  }
 0x231   : > { %1249 = dma.hbm_to_vmem [thread:$0]  (%p2323_p7), %s555_s7, 16, %s557_s3, %s940_s25 }
 0x232   : > { %p562_p10 = scmp.gt.s32.totalorder %s2597_s30, 0  ;;  %p1133_p8 = scmp.lt.s32.totalorder %s2597_s30, 63 }
 0x233   : > { %s2621_s10 = sshll.u32 %s944_s9, 4  ;;  %s947_s6 = scalar_lea.sflag %s2406_s11, 7 [#allocation3]  ;;  %s580_s10 = int_to_ptr.vmem [resolvable:$true] %s2621_s10 }
 0x234   : > { %s2925_s30 = smov (!%p562_p10, %s2597_s30), 0 }
 0x235   : > { %s2927_s30 = smov (!%p1133_p8, %s2925_s30), 63 }
 0x236   : > { %s566_s21 = scalar_lea.hbm %s2713_s1, %s2927_s30 }
 0x237   : > { %s577_s18 = sshll.u32 %s566_s21, 4  ;;  %s578_s18 = int_to_ptr.hbm [resolvable:$true] %s577_s18 }
 0x238   : > { %s1771_s4 = sshra.s32 %s578_s18, 4  ;;  %s1772_s4 = int_to_ptr.hbm [resolvable:$true] %s1771_s4 }
 0x239   : > { %s1773_s8 = scalar_lea.hbm %s1772_s4, 1  ;;  %p1778_p11 = scmp.lt.s32.totalorder %s1772_s4, %s2713_s1 }
 0x23a   : > { %p1774_p5 = scmp.ne.s32.totalorder %s1772_s4, %s1773_s8  ;;  %p1779_p12 = scmp.lt.s32.totalorder %s2092_s27, %s1773_s8 }
 0x23c   : > { %p1775_p3 = pnand %p1774_p5, %p2323_p7  ;;  %p1780_p0 = por %p1779_p12, %p1778_p11 }
 0x23e   : > { %p1776_p6 = pneg %p1775_p3 }
 0x240   : > { %p1781_p13 = pnand %p1780_p0, %p1776_p6 }
 0x242   : > { %1784 = shalt.err (!%p1781_p13)  }
 0x243   : > { %s1785_s11 = sshra.s32 %s580_s10, 4  ;;  %s1786_s11 = int_to_ptr.vmem [resolvable:$true] %s1785_s11 }
 0x244   : > { %s1787_s30 = scalar_lea.vmem %s1786_s11, 1  ;;  %p1792_p9 = scmp.lt.s32.totalorder %s1786_s11, [#allocation2] }
 0x245   : > { %p1788_p1 = scmp.ne.s32.totalorder %s1786_s11, %s1787_s30  ;;  %p1793_p10 = scmp.lt.s32.totalorder %s2101_s17, %s1787_s30 }
 0x247   : > { %p1789_p2 = pnand %p1788_p1, %p2323_p7  ;;  %p1794_p8 = por %p1793_p10, %p1792_p9 }
 0x249   : > { %p1790_p4 = pneg %p1789_p2 }
 0x24b   : > { %p1795_p5 = pnand %p1794_p8, %p1790_p4 }
 0x24d   : > { %1798 = shalt.err (!%p1795_p5)  }
 0x24e   : > { %1252 = dma.hbm_to_vmem [thread:$0]  (%p2323_p7), %s578_s18, 16, %s580_s10, %s947_s6 }
 0x24f   : > { %s185_s27 = scalar_lea.vmem [#allocation6], %s2025_s16 }
 0x250   : > { %1861 = dma.done.wait %s2060_s13, 16 }
 0x251   : > { %1862 = vsyncadd %s2060_s13, 4294967280 }
 0x252   : > { %1863 = dma.done.wait %s2063_s2, 16 }
 0x253   : > { %1864 = vsyncadd %s2063_s2, 4294967280 }
 0x254   : > { %1865 = dma.done.wait %s2080_s14, 16 }
 0x255   : > { %1866 = vsyncadd %s2080_s14, 4294967280 }
 0x256   : > { %1867 = dma.done.wait %s2156_s20, 16 }
 0x257   : > { %1868 = vsyncadd %s2156_s20, 4294967280 }
 0x258   : > { %1869 = dma.done.wait %s2169_s29, 16 }
 0x259   : > { %1870 = vsyncadd %s2169_s29, 4294967280 }
 0x25a   : > { %1871 = dma.done.wait %s2234_s24, 16 }
 0x25b   : > { %1872 = vsyncadd %s2234_s24, 4294967280 }
 0x25c   : > { %1873 = dma.done.wait %s2247_s22, 16 }
 0x25d   : > { %1874 = vsyncadd %s2247_s22, 4294967280  ;;  %s2806_s2 = sld [smem:[#allocation82_spill]] }
 0x263   : > { %1875 = dma.done.wait %s2806_s2, 16 }
 0x264   : > { %1876 = vsyncadd %s2806_s2, 4294967280  ;;  %s2807_s14 = sld [smem:[#allocation81_spill]]  ;;  %v1915_v3 = vmov 128.0   ;;  %v1916_v14 = vmov 127.0   ;;  %s696_s10 = sshll.u32 %s185_s27, 4  ;;  %s697_s10 = int_to_ptr.vmem [resolvable:$true] %s696_s10 }
 0x265   : > { %s2808_s13 = sld [smem:[#allocation79_spill]]  ;;  %1331 = vrcp.f32 %v1915_v3 }
 0x266   : > { %1333 = vrcp.f32 %v1916_v14  ;;  %s2809_s17 = sld [smem:[#allocation80_spill]] }
 0x267   : > { %s2810_s22 = sld [smem:[#allocation86_spill]] }
 0x268   : > { %s2811_s7 = sld [smem:[#allocation88_spill]] }
 0x269   : > { %s2812_s9 = sld [smem:[#allocation69_spill]] }
 0x26a   : > { %v617_v0 = vld [vmem:[%s2807_s14] sm:$0xff]  ;;  %s2813_s0 = sld [smem:[#allocation75_spill]] }
 0x26b   : > { %v618_v1 = vld [vmem:[%s2808_s13] sm:$0xff]  ;;  %v1332_v4 = vpop.eup %1331  ;;  %s2814_s15 = sld [smem:[#allocation87_spill]] }
 0x26c   : > { %v619_v2 = vadd.f32 %v618_v1, %v617_v0  ;;  %v623_v5 = vmul.f32 128.0, %v1332_v4  ;;  %vm627_vm0 = vweird.f32 %v1332_v4  ;;  %v1334_v15 = vpop.eup %1333 }
 0x26d   : > { %v635_v16 = vmul.f32 127.0, %v1334_v15  ;;  %vm639_vm1 = vweird.f32 %v1334_v15  ;;  %v1329_v38 = vld [vmem:[%s2810_s22] ss:$0 sm:$0xff] }
 0x26e   : > { %620 = vadd.xlane.f32.xlu0 %v619_v2  ;;  %v624_v6 = vsub.f32 1.0, %v623_v5  ;;  %s694_s23 = scalar_lea.hbm %s2811_s7, %s2809_s17  ;;  %s1819_s3 = scalar_lea.hbm %s2811_s7, 32 }
 0x26f   : > { %v636_v17 = vsub.f32 1.0, %v635_v16  ;;  %s698_s6 = sshll.u32 %s694_s23, 4  ;;  %s2815_s12 = sand.u32 1, %s2812_s9   ;;  %s699_s6 = int_to_ptr.hbm [resolvable:$true] %s698_s6 }
 0x270   : > { %v625_v7 = vmul.f32 %v1332_v4, %v624_v6  ;;  %s682_s28 = scalar_lea.sflag [#allocation7], %s2815_s12  ;;  %s1813_s21 = sshra.s32 %s699_s6, 4  ;;  %s1814_s21 = int_to_ptr.hbm [resolvable:$true] %s1813_s21 }
 0x271   : > { %v637_v18 = vmul.f32 %v1334_v15, %v636_v17  ;;  %v1330_v45 = vld [vmem:[%s2814_s15] ss:$0 sm:$0xff]  ;;  %s1815_s18 = scalar_lea.hbm %s1814_s21, 8  ;;  %p2816_p3 = scmp.ne.s32.totalorder %s2813_s0, 0 }
 0x272   : > { %v626_v8 = vadd.f32 %v1332_v4, %v625_v7  ;;  %p1816_p7 = scmp.ne.s32.totalorder %s1814_s21, %s1815_s18  ;;  %p1820_p12 = scmp.lt.s32.totalorder %s1814_s21, %s2811_s7 }
 0x273   : > { %v638_v19 = vadd.f32 %v1334_v15, %v637_v18  ;;  %p1821_p0 = scmp.lt.s32.totalorder %s1819_s3, %s1815_s18 }
 0x274   : > { %v628_v9 = vsel %vm627_vm0, %v1332_v4, %v626_v8  ;;  %p1817_p6 = pnand %p1816_p7, %p2816_p3 }
 0x275   : > { %v640_v20 = vsel %vm639_vm1, %v1334_v15, %v638_v19  ;;  %p1822_p13 = por %p1821_p0, %p1820_p12 }
 0x276   : > { %p1818_p11 = pneg %p1817_p6 }
 0x278   : > { %p1823_p1 = pnand %p1822_p13, %p1818_p11 }
 0x2e1   : > { %v621_v10 = vpop.xlane.xlu0 %620 }
 0x2e2   : > { %v629_v11 = vmul.f32 %v628_v9, %v621_v10 }
 0x2e4   : > { %v630_v12 = vsub.f32 %v619_v2, %v629_v11 }
 0x2e6   : > { %v631_v13 = vmul.f32 %v630_v12, %v630_v12  ;;  %v673_v43 = vmul.f32 %v1329_v38, %v630_v12 }
 0x2e8   : > { %632 = vadd.xlane.f32.xlu0 %v631_v13 }
 0x35b   : > { %v633_v21 = vpop.xlane.xlu0 %632 }
 0x35c   : > { %v641_v22 = vmul.f32 %v640_v20, %v633_v21 }
 0x35e   : > { %1335 = vrsqrt.f32 %v641_v22  ;;  %vm649_vm2 = vcmp.eq.f32.partialorder %v641_v22, inf  ;;  %v652_v30 = vand.u32 2147483648, %v641_v22  ;;  %vm651_vm3 = vcmp.eq.f32.partialorder %v641_v22, 0.0 }
 0x364   : > { %v1336_v23 = vpop.eup %1335 }
 0x365   : > { %v643_v24 = vmul.f32 %v1336_v23, %v641_v22 }
 0x367   : > { %v644_v25 = vmul.f32 %v1336_v23, %v643_v24 }
 0x369   : > { %v645_v26 = vmul.f32 0.5, %v644_v25 }
 0x36b   : > { %v646_v27 = vsub.f32 1.5, %v645_v26 }
 0x36d   : > { %v647_v28 = vmul.f32 %v1336_v23, %v646_v27 }
 0x36f   : > { %v648_v29 = vmul.f32 %v647_v28, %v641_v22 }
 0x371   : > { %v650_v31 = vsel %vm649_vm2, %v641_v22, %v648_v29 }
 0x372   : > { %v653_v32 = vsel %vm651_vm3, %v652_v30, %v650_v31 }
 0x373   : > { %v654_v33 = vadd.f32 1e-06, %v653_v32 }
 0x375   : > { %1337 = vrcp.f32 %v654_v33  ;;  %v666_v37 = vand.u32 2147483648, %v654_v33  ;;  %v664_v40 = vand.u32 2147483647, %v654_v33  ;;  %vm660_vm5 = vweird.f32 %v654_v33 }
 0x377   : > { %v667_v42 = vor.u32 1.1754944e-38, %v666_v37  ;;  %vm665_vm7 = vcmp.eq.f32.partialorder %v664_v40, 8.507059e+37 }
 0x37b   : > { %v1338_v34 = vpop.eup %1337 }
 0x37c   : > { %v656_v35 = vmul.f32 %v1338_v34, %v654_v33  ;;  %vm661_vm4 = vweird.f32 %v1338_v34 }
 0x37d   : > { %vm662_vm6 = vmor %vm660_vm5, %vm661_vm4 }
 0x37e   : > { %v657_v36 = vsub.f32 1.0, %v656_v35 }
 0x380   : > { %v658_v39 = vmul.f32 %v1338_v34, %v657_v36 }
 0x382   : > { %v659_v41 = vadd.f32 %v1338_v34, %v658_v39 }
 0x384   : > { %v663_v44 = vsel %vm662_vm6, %v1338_v34, %v659_v41 }
 0x385   : > { %v668_v46 = vsel %vm665_vm7, %v667_v42, %v663_v44 }
 0x386   : > { %v674_v47 = vmul.f32 %v673_v43, %v668_v46 }
 0x388   : > { %v679_v48 = vadd.f32 %v1330_v45, %v674_v47 }
 0x38a   : > { %680 = vst [vmem:[%s185_s27] sm:$0xff] %v679_v48 }
 0x38b   : > { %1826 = shalt.err (!%p1823_p1)
}
 0x38c   : > { %1253 = dma.vmem_to_hbm [thread:$0]  (%p2816_p3), %s697_s10, 128, %s699_s6, %s682_s28  }
 0x38d PF: > { %s2817_s16 = sld [smem:[#allocation73_spill]] }
 0x38e   : > { %s2818_s30 = sld [smem:[#allocation68_spill]] }
 0x38f   : > { %s2819_s27 = sld [smem:[#allocation77_spill]] }
 0x393   : > { %p1261_p2 = scmp.ge.s32.totalorder %s2817_s16, 2 }
 0x394   : > { %s710_s2 = sand.u32 1, %s2818_s30  }
 0x395   : > { %p2820_p4 = scmp.ne.s32.totalorder %s2819_s27, 0  ;;  %s711_s14 = scalar_lea.sflag [#allocation7], %s710_s2 }
 0x397   : > { %p1256_p9 = pnand %p1261_p2, %p2820_p4 }
 0x399   : > { %p1257_p10 = pneg %p1256_p9 }
 0x39b   : > { %1878 = dma.done.wait (%p1257_p10), %s711_s14, 128  }
 0x39c   : > { %1880 = vsyncadd (%p1257_p10), %s711_s14, 4294967168  ;;  %s26_s28 = sadd.s32 1, %s2817_s16   ;;  %s2821_s22 = sld [smem:[#allocation69_spill]] }
 0x39d   : > { %p23_p8 = scmp.ge.s32.totalorder %s26_s28, 6   ;;  %s2822_s23 = sld [smem:[#allocation70_spill]] }
 0x39e   : > { %s2823_s24 = sld [smem:[#allocation78_spill]] }
 0x39f   : > { %s2824_s25 = sld [smem:[#allocation71_spill]]  ;;  %25 = sbr.rel (!%p23_p8) target bundleno = 14 (0xe), region = 211 }
 0x3a0   : > { %s2825_s26 = sld [smem:[#allocation72_spill]] }
 0x3a1   : > { %s2826_s27 = sld [smem:[#allocation74_spill]] }
 0x3a2   : > { %s2827_s0 = sld [smem:[#allocation76_spill]] }
 0x3a4   :  { %717 = vsyncpa [#allocation7], 1 }
 0x3a5   :  { %719 = vsyncpa [#allocation7 + $0x1], 1 }
 0x3a6   :  { %720 = vsyncmov [#allocation3] }
 0x3a9   :  { %s721_s13 = vpop.sfrf %720 }
 0x3aa   :  { %p1153_p5 = scmp.ne.s32.totalorder %s721_s13, 0 }
 0x3ac   :  { %725 = shalt.err (%p1153_p5)  }
 0x3ad   :  { %727 = vsyncmov [#allocation3 + $0x1] }
 0x3b0   :  { %s728_s17 = vpop.sfrf %727 }
 0x3b1   :  { %p1154_p7 = scmp.ne.s32.totalorder %s728_s17, 0 }
 0x3b3   :  { %732 = shalt.err (%p1154_p7)  }
 0x3b4   :  { %734 = vsyncmov [#allocation3 + $0x2] }
 0x3b7   :  { %s735_s29 = vpop.sfrf %734 }
 0x3b8   :  { %p1155_p3 = scmp.ne.s32.totalorder %s735_s29, 0 }
 0x3ba   :  { %739 = shalt.err (%p1155_p3)  }
 0x3bb   :  { %741 = vsyncmov [#allocation3 + $0x3] }
 0x3be   :  { %s742_s20 = vpop.sfrf %741 }
 0x3bf   :  { %p1156_p6 = scmp.ne.s32.totalorder %s742_s20, 0 }
 0x3c1   :  { %746 = shalt.err (%p1156_p6)  }
 0x3c2   :  { %748 = vsyncmov [#allocation3 + $0x4] }
 0x3c5   :  { %s749_s5 = vpop.sfrf %748 }
 0x3c6   :  { %p1157_p11 = scmp.ne.s32.totalorder %s749_s5, 0 }
 0x3c8   :  { %753 = shalt.err (%p1157_p11)  }
 0x3c9   :  { %755 = vsyncmov [#allocation3 + $0x5] }
 0x3cc   :  { %s756_s1 = vpop.sfrf %755 }
 0x3cd   :  { %p1158_p12 = scmp.ne.s32.totalorder %s756_s1, 0 }
 0x3cf   :  { %760 = shalt.err (%p1158_p12)  }
 0x3d0   :  { %762 = vsyncmov [#allocation3 + $0x6] }
 0x3d3   :  { %s763_s22 = vpop.sfrf %762 }
 0x3d4   :  { %p1159_p0 = scmp.ne.s32.totalorder %s763_s22, 0 }
 0x3d6   :  { %767 = shalt.err (%p1159_p0)  }
 0x3d7   :  { %769 = vsyncmov [#allocation3 + $0x7] }
 0x3da   :  { %s770_s24 = vpop.sfrf %769 }
 0x3db   :  { %p1160_p13 = scmp.ne.s32.totalorder %s770_s24, 0 }
 0x3dd   :  { %774 = shalt.err (%p1160_p13)  }
 0x3de   :  { %776 = vsyncmov [#allocation3 + $0x8] }
 0x3e1   :  { %s777_s7 = vpop.sfrf %776 }
 0x3e2   :  { %p1161_p1 = scmp.ne.s32.totalorder %s777_s7, 0 }
 0x3e4   :  { %781 = shalt.err (%p1161_p1)  }
 0x3e5   :  { %783 = vsyncmov [#allocation3 + $0x9] }
 0x3e8   :  { %s784_s9 = vpop.sfrf %783 }
 0x3e9   :  { %p1162_p2 = scmp.ne.s32.totalorder %s784_s9, 0 }
 0x3eb   :  { %788 = shalt.err (%p1162_p2)  }
 0x3ec   :  { %790 = vsyncmov [#allocation3 + $0xa] }
 0x3ef   :  { %s791_s23 = vpop.sfrf %790 }
 0x3f0   :  { %p1163_p4 = scmp.ne.s32.totalorder %s791_s23, 0 }
 0x3f2   :  { %795 = shalt.err (%p1163_p4)  }
 0x3f3   :  { %797 = vsyncmov [#allocation3 + $0xb] }
 0x3f6   :  { %s798_s0 = vpop.sfrf %797 }
 0x3f7   :  { %p1164_p9 = scmp.ne.s32.totalorder %s798_s0, 0 }
 0x3f9   :  { %802 = shalt.err (%p1164_p9)  }
 0x3fa   :  { %804 = vsyncmov [#allocation3 + $0xc] }
 0x3fd   :  { %s805_s19 = vpop.sfrf %804 }
 0x3fe   :  { %p1165_p10 = scmp.ne.s32.totalorder %s805_s19, 0 }
 0x400   :  { %809 = shalt.err (%p1165_p10)  }
 0x401   :  { %811 = vsyncmov [#allocation3 + $0xd] }
 0x404   :  { %s812_s26 = vpop.sfrf %811 }
 0x405   :  { %p1166_p8 = scmp.ne.s32.totalorder %s812_s26, 0 }
 0x407   :  { %816 = shalt.err (%p1166_p8)  }
 0x408   :  { %818 = vsyncmov [#allocation3 + $0xe] }
 0x40b   :  { %s819_s15 = vpop.sfrf %818 }
 0x40c   :  { %p1167_p5 = scmp.ne.s32.totalorder %s819_s15, 0 }
 0x40e   :  { %823 = shalt.err (%p1167_p5)  }
 0x40f   :  { %825 = vsyncmov [#allocation3 + $0xf] }
 0x412   :  { %s826_s10 = vpop.sfrf %825 }
 0x413   :  { %p1168_p7 = scmp.ne.s32.totalorder %s826_s10, 0 }
 0x415   :  { %830 = shalt.err (%p1168_p7)  }

</bundles_post_ra>
